<compile_context>
chip_gen: v7x
topology: tpu7x:2x2x1
jax: 0.10.0
libtpu: 0.0.40
codegen_flags: <defaults>
</compile_context>

<pallas_src>
import jax
import jax.numpy as jnp
from jax import lax
from jax.experimental import pallas as pl
from jax.experimental.pallas import tpu as pltpu


def coattention_kernel(
    sent_ref,        # (BB, Ls, H)  compute dtype (bf16 default), mask-zeroed rows
    table_ref,       # (BB, Lt, H)  compute dtype, mask-zeroed rows
    smask_ref,       # (BB, Ls)     f32, lane-dense (score -inf masking)
    tmask_ref,       # (BB, Lt)     f32, lane-dense
    waff_t_ref,      # (H, H) = W_aff.T    compute dtype
    ws_t_ref,        # (H, H) = W_sent.T   compute dtype
    wt_t_ref,        # (H, H) = W_table.T  compute dtype
    ws2_ref,         # (1, H) = W_sent2    f32 (VPU mul + lane reduce)
    wt2_ref,         # (1, H) = W_table2   f32
    p_sent_ref,      # (BB, Ls) f32  lane-dense softmax output
    p_table_ref,     # (BB, Lt) f32
):
    BB, Ls, H = sent_ref.shape
    Lt = table_ref.shape[1]
    cdt = sent_ref.dtype                      # MXU operand dtype (bf16 or f32)

    sent = sent_ref[...]                      # (BB, Ls, H)
    table = table_ref[...]                    # (BB, Lt, H)

    # ---- Shared-weight linears: flatten batch into M for big MXU matmuls ----
    sent2d = sent.reshape(BB * Ls, H)
    table2d = table.reshape(BB * Lt, H)

    tab_aff = jnp.dot(
        table2d, waff_t_ref[...], preferred_element_type=jnp.float32
    ).reshape(BB, Lt, H).astype(cdt)
    sent_lin = jnp.dot(
        sent2d, ws_t_ref[...], preferred_element_type=jnp.float32
    ).reshape(BB, Ls, H)                      # f32 (needed for the residual add)
    tab_lin = jnp.dot(
        table2d, wt_t_ref[...], preferred_element_type=jnp.float32
    ).reshape(BB, Lt, H)                      # f32

    # ---- Affinity: sent[b] @ (table[b] @ W_aff.T).T --------------------------
    # Embedding rows were pre-zeroed by the wrapper, so this is already the
    # masked affinity matrix of the reference (binary masks).
    affinity = lax.dot_general(
        sent, tab_aff,
        dimension_numbers=(((2,), (2,)), ((0,), (0,))),
        preferred_element_type=jnp.float32,
    )                                          # (BB, Ls, Lt) f32
    aff_c = affinity.astype(cdt)               # MXU operand for the contexts

    smask = smask_ref[...]                     # (BB, Ls) f32
    tmask = tmask_ref[...]                     # (BB, Lt) f32
    neg_inf = jnp.float32(-jnp.inf)

    def softmax_lane(x):                       # softmax over the lane axis
        m = jnp.max(x, axis=-1, keepdims=True)
        e = jnp.exp(x - m)
        return e * pl.reciprocal(jnp.sum(e, axis=-1, keepdims=True), approx=False)

    # ---- Sentence branch (finished first -> lower peak liveness) ------------
    sent_ctx = lax.dot_general(                # affinity @ tab_lin -> (BB, Ls, H)
        aff_c, tab_lin.astype(cdt),
        dimension_numbers=(((2,), (1,)), ((0,), (0,))),
        preferred_element_type=jnp.float32,
    )
    h_sent = jnp.tanh(sent_lin + sent_ctx)
    score_s = jnp.sum(h_sent * ws2_ref[...].reshape(1, 1, H), axis=-1)  # (BB, Ls)
    score_s = jnp.where(smask == 0.0, neg_inf, score_s)
    p_sent_ref[...] = softmax_lane(score_s)

    # ---- Table branch --------------------------------------------------------
    tab_ctx = lax.dot_general(                 # affinity.T @ sent_lin -> (BB, Lt, H)
        aff_c, sent_lin.astype(cdt),
        dimension_numbers=(((1,), (1,)), ((0,), (0,))),
        preferred_element_type=jnp.float32,
    )
    h_table = jnp.tanh(tab_lin + tab_ctx)
    score_t = jnp.sum(h_table * wt2_ref[...].reshape(1, 1, H), axis=-1)  # (BB, Lt)
    score_t = jnp.where(tmask == 0.0, neg_inf, score_t)
    p_table_ref[...] = softmax_lane(score_t)


def _round_up(x, m):
    return ((x + m - 1) // m) * m


def _auto_block_b(B, Lsp, Ltp, H, cdt_bytes, vmem_budget_bytes):
    """Pick BB so BB*max(Ls,Lt) >= ~512 MXU rows, within a VMEM budget."""
    lmax = max(Lsp, Ltp)
    bb = max(8, _round_up(-(-512 // lmax), 8))
    bb = min(bb, _round_up(B, 8))

    def est(b):
        return (2 * b * (Lsp + Ltp) * H * cdt_bytes      # double-buffered embedding blocks
                + 4 * b * (Lsp + Ltp) * 4                # mask inputs + outputs (dbl-buffered)
                + b * Lsp * Ltp * (4 + cdt_bytes)        # affinity (f32 + compute-dtype copy)
                + 5 * b * lmax * H * 4                   # live (b, L, H) f32 intermediates
                + 6 * H * H * cdt_bytes)                 # weights (worst case: dbl-buffered)

    while bb > 8 and est(bb) > vmem_budget_bytes:
        bb -= 8
    return bb


def coattention_pallas(
    sent_emb, table_emb, sent_mask, table_mask, params, *,
    compute_dtype=jnp.bfloat16,    # MXU-operand dtype; jnp.float32 for validation
    block_b=None,                  # batch rows per grid step (None -> auto)
    seq_align=8,                   # pad Ls/Lt to this multiple (128 in production
                                   # for unmasked lane-dense output stores)
    vmem_limit_bytes=None,         # optional explicit scoped-VMEM limit (e.g. v7x)
    vmem_budget_bytes=24 * 1024 * 1024,
):
    """Bi-modal co-attention forward.  Returns (p_sent (B,Ls,1), p_table (B,Lt,1)).

    Assumes binary (0/1) masks, as produced by the module's masked_fill usage.
    """
    B, Ls, H = sent_emb.shape
    Lt = table_emb.shape[1]
    cdt = jnp.dtype(compute_dtype)

    smask_f = sent_mask.astype(jnp.float32)
    tmask_f = table_mask.astype(jnp.float32)

    # Zero masked embedding rows up front (fuses with the cast below).  For
    # binary masks this is exactly `affinity * (smask ⊗ tmask)` of the module,
    # so the kernel needs no affinity mask at all.
    sent_f = (sent_emb.astype(jnp.float32) * smask_f[:, :, None]).astype(cdt)
    table_f = (table_emb.astype(jnp.float32) * tmask_f[:, :, None]).astype(cdt)

    # --- sequence padding (>=8 keeps the in-kernel (BB*L, H) reshapes free) ---
    Lsp = _round_up(Ls, seq_align)
    Ltp = _round_up(Lt, seq_align)
    if Lsp != Ls:
        sent_f = jnp.pad(sent_f, ((0, 0), (0, Lsp - Ls), (0, 0)))
        smask_f = jnp.pad(smask_f, ((0, 0), (0, Lsp - Ls)))   # zeros -> p == 0, sliced
    if Ltp != Lt:
        table_f = jnp.pad(table_f, ((0, 0), (0, Ltp - Lt), (0, 0)))
        tmask_f = jnp.pad(tmask_f, ((0, 0), (0, Ltp - Lt)))

    # --- batch blocking --------------------------------------------------------
    if block_b is None:
        block_b = _auto_block_b(B, Lsp, Ltp, H, cdt.itemsize, vmem_budget_bytes)
    if B <= block_b:
        BB, Bp = B, B          # single step, block == full batch: no padded rows
    else:
        BB = block_b
        Bp = _round_up(B, BB)
    pad_b = Bp - B
    if pad_b:
        sent_f = jnp.pad(sent_f, ((0, pad_b), (0, 0), (0, 0)))
        table_f = jnp.pad(table_f, ((0, pad_b), (0, 0), (0, 0)))
        # Padded batch rows get all-ones masks so their softmax stays finite
        # (uniform); they are sliced off below.
        smask_f = jnp.pad(smask_f, ((0, pad_b), (0, 0)), constant_values=1.0)
        tmask_f = jnp.pad(tmask_f, ((0, pad_b), (0, 0)), constant_values=1.0)

    # --- weights: nn.Linear(x) = x @ W.T ---------------------------------------
    waff_t = params["W_aff"].T.astype(cdt)
    ws_t = params["W_sent"].T.astype(cdt)
    wt_t = params["W_table"].T.astype(cdt)
    ws2 = params["W_sent2"].astype(jnp.float32)    # (1, H): VPU mul + lane reduce
    wt2 = params["W_table2"].astype(jnp.float32)

    def build(single_buffer_weights):
        if single_buffer_weights:
            # Grid-invariant weights: no need for double buffering.
            def wspec(shape):
                return pl.BlockSpec(shape, lambda b: (0, 0),
                                    pipeline_mode=pl.Buffered(buffer_count=1))
        else:
            def wspec(shape):
                return pl.BlockSpec(shape, lambda b: (0, 0))

        grid_spec = pltpu.PrefetchScalarGridSpec(
            num_scalar_prefetch=0,
            grid=(Bp // BB,),
            in_specs=[
                pl.BlockSpec((BB, Lsp, H), lambda b: (b, 0, 0)),
                pl.BlockSpec((BB, Ltp, H), lambda b: (b, 0, 0)),
                pl.BlockSpec((BB, Lsp), lambda b: (b, 0)),
                pl.BlockSpec((BB, Ltp), lambda b: (b, 0)),
                wspec((H, H)),
                wspec((H, H)),
                wspec((H, H)),
                wspec((1, H)),
                wspec((1, H)),
            ],
            out_specs=[
                pl.BlockSpec((BB, Lsp), lambda b: (b, 0)),
                pl.BlockSpec((BB, Ltp), lambda b: (b, 0)),
            ],
        )
        cp_kwargs = dict(dimension_semantics=("parallel",))
        if vmem_limit_bytes is not None:
            cp_kwargs["vmem_limit_bytes"] = vmem_limit_bytes
        return pl.pallas_call(
            coattention_kernel,
            out_shape=[
                jax.ShapeDtypeStruct((Bp, Lsp), jnp.float32),
                jax.ShapeDtypeStruct((Bp, Ltp), jnp.float32),
            ],
            grid_spec=grid_spec,
            compiler_params=pltpu.CompilerParams(**cp_kwargs),
        )

    args = (sent_f, table_f, smask_f, tmask_f, waff_t, ws_t, wt_t, ws2, wt2)
    try:
        outs = jax.block_until_ready(build(True)(*args))
    except Exception:
        # Fallback for JAX builds that reject Buffered(1) on pallas_call inputs.
        outs = jax.block_until_ready(build(False)(*args))
    p_sent, p_table = outs

    # Slice off padding and restore the module's (B, L, 1) layout.
    return (p_sent[:B, :Ls].reshape(B, Ls, 1),
            p_table[:B, :Lt].reshape(B, Lt, 1))


def coattention_ref(sent_emb, table_emb, sent_mask, table_mask, params):
    """Pure-JAX f32 reference mirroring the PyTorch forward exactly."""
    smask = sent_mask.astype(jnp.float32)
    tmask = table_mask.astype(jnp.float32)
    mask = smask[..., :, None] * tmask[..., None, :]
    affinity = jnp.einsum("bsh,bth->bst", sent_emb, table_emb @ params["W_aff"].T) * mask
    sent_lin = sent_emb @ params["W_sent"].T
    tab_lin = table_emb @ params["W_table"].T
    h_sent = jnp.tanh(sent_lin + jnp.einsum("bst,bth->bsh", affinity, tab_lin))
    h_table = jnp.tanh(tab_lin + jnp.einsum("bst,bsh->bth", affinity, sent_lin))
    s_s = h_sent @ params["W_sent2"].T
    s_t = h_table @ params["W_table2"].T
    s_s = jnp.where(smask[..., None] == 0, -jnp.inf, s_s)
    s_t = jnp.where(tmask[..., None] == 0, -jnp.inf, s_t)
    return jax.nn.softmax(s_s, axis=-2), jax.nn.softmax(s_t, axis=-2)


def init_params(key, hidden_size):
    """Deterministic init mimicking nn.Linear(bias=False): U(-1/sqrt(in), 1/sqrt(in))."""
    ks = jax.random.split(key, 5)
    bound = 1.0 / jnp.sqrt(hidden_size)
    u = lambda k, shape: jax.random.uniform(
        k, shape, jnp.float32, minval=-bound, maxval=bound
    )
    return {
        "W_aff": u(ks[0], (hidden_size, hidden_size)),
        "W_sent": u(ks[1], (hidden_size, hidden_size)),
        "W_table": u(ks[2], (hidden_size, hidden_size)),
        "W_sent2": u(ks[3], (1, hidden_size)),
        "W_table2": u(ks[4], (1, hidden_size)),
    }


if __name__ == "__main__":
    B, Ls, Lt, H = 2, 8, 8, 32

    key = jax.random.PRNGKey(0)
    k_sent, k_table, k_params = jax.random.split(key, 3)

    sent_emb = jax.random.normal(k_sent, (B, Ls, H), jnp.float32)
    table_emb = jax.random.normal(k_table, (B, Lt, H), jnp.float32)

    # Length-style binary masks (at least one valid token per sequence).
    sent_lens = jnp.array([6, 8])
    table_lens = jnp.array([8, 5])
    sent_mask = (jnp.arange(Ls)[None, :] < sent_lens[:, None]).astype(jnp.int32)
    table_mask = (jnp.arange(Lt)[None, :] < table_lens[:, None]).astype(jnp.int32)

    params = init_params(k_params, H)

    p_ref_s, p_ref_t = coattention_ref(sent_emb, table_emb, sent_mask, table_mask, params)

    # f32 compute path: tight check against the f32 reference.
    p_s32, p_t32 = coattention_pallas(
        sent_emb, table_emb, sent_mask, table_mask, params,
        compute_dtype=jnp.float32)
    jax.block_until_ready((p_s32, p_t32))
    assert p_s32.shape == (B, Ls, 1) and p_t32.shape == (B, Lt, 1)
    assert jnp.allclose(p_s32, p_ref_s, atol=1e-5, rtol=1e-5)
    assert jnp.allclose(p_t32, p_ref_t, atol=1e-5, rtol=1e-5)

    # bf16 compute path (the performance configuration): looser tolerance.
    p_s16, p_t16 = coattention_pallas(
        sent_emb, table_emb, sent_mask, table_mask, params)
    jax.block_until_ready((p_s16, p_t16))
    assert p_s16.shape == (B, Ls, 1) and p_t16.shape == (B, Lt, 1)
    assert jnp.allclose(p_s16, p_ref_s, atol=3e-2)
    assert jnp.allclose(p_t16, p_ref_t, atol=3e-2)
    assert jnp.allclose(jnp.sum(p_s16, axis=1), 1.0, atol=1e-3)
    assert jnp.allclose(jnp.sum(p_t16, axis=1), 1.0, atol=1e-3)

    print("KERNEL_OK")
</pallas_src>

<mosaic_0001>
module attributes {stable_mosaic.version = 11 : i64} {
  func.func @coattention_kernel(%arg0: i32, %arg1: memref<2x8x32xf32, #tpu.memory_space<vmem>>, %arg2: memref<2x8x32xf32, #tpu.memory_space<vmem>>, %arg3: memref<2x8xf32, #tpu.memory_space<vmem>>, %arg4: memref<2x8xf32, #tpu.memory_space<vmem>>, %arg5: memref<32x32xf32, #tpu.memory_space<vmem>>, %arg6: memref<32x32xf32, #tpu.memory_space<vmem>>, %arg7: memref<32x32xf32, #tpu.memory_space<vmem>>, %arg8: memref<1x32xf32, #tpu.memory_space<vmem>>, %arg9: memref<1x32xf32, #tpu.memory_space<vmem>>, %arg10: memref<2x8xf32, #tpu.memory_space<vmem>>, %arg11: memref<2x8xf32, #tpu.memory_space<vmem>>) attributes {dimension_semantics = [#tpu.dimension_semantics<parallel>], iteration_bounds = array<i64: 1>, scalar_prefetch = 0 : i64, scratch_operands = 0 : i64, tpu.core_type = #tpu.core_type<tc>, window_params = [{transform_indices = @transform_0, window_bounds = array<i64: 2, 8, 32>}, {transform_indices = @transform_1, window_bounds = array<i64: 2, 8, 32>}, {transform_indices = @transform_2, window_bounds = array<i64: 2, 8>}, {transform_indices = @transform_3, window_bounds = array<i64: 2, 8>}, {pipeline_mode = #tpu.pipeline_mode<synchronous>, transform_indices = @transform_4, window_bounds = array<i64: 32, 32>}, {pipeline_mode = #tpu.pipeline_mode<synchronous>, transform_indices = @transform_5, window_bounds = array<i64: 32, 32>}, {pipeline_mode = #tpu.pipeline_mode<synchronous>, transform_indices = @transform_6, window_bounds = array<i64: 32, 32>}, {pipeline_mode = #tpu.pipeline_mode<synchronous>, transform_indices = @transform_7, window_bounds = array<i64: 1, 32>}, {pipeline_mode = #tpu.pipeline_mode<synchronous>, transform_indices = @transform_8, window_bounds = array<i64: 1, 32>}, {transform_indices = @transform_9, window_bounds = array<i64: 2, 8>}, {transform_indices = @transform_10, window_bounds = array<i64: 2, 8>}]} {
    %c0 = arith.constant 0 : index
    %c0_0 = arith.constant 0 : index
    %c0_1 = arith.constant 0 : index
    %0 = vector.load %arg1[%c0, %c0_0, %c0_1] : memref<2x8x32xf32, #tpu.memory_space<vmem>>, vector<2x8x32xf32>
    %c0_2 = arith.constant 0 : index
    %c0_3 = arith.constant 0 : index
    %c0_4 = arith.constant 0 : index
    %1 = vector.load %arg2[%c0_2, %c0_3, %c0_4] : memref<2x8x32xf32, #tpu.memory_space<vmem>>, vector<2x8x32xf32>
    %2 = vector.shape_cast %0 : vector<2x8x32xf32> to vector<16x32xf32>
    %3 = vector.shape_cast %1 : vector<2x8x32xf32> to vector<16x32xf32>
    %c0_5 = arith.constant 0 : index
    %c0_6 = arith.constant 0 : index
    %4 = vector.load %arg5[%c0_5, %c0_6] : memref<32x32xf32, #tpu.memory_space<vmem>>, vector<32x32xf32>
    %cst = arith.constant dense<0.000000e+00> : vector<16x32xf32>
    %5 = tpu.matmul %3, %4, %cst {dimension_numbers = #tpu.dot_dimension_numbers<[1], [0], [0], [1], [0, 0, 1, 1], [], []>} : vector<16x32xf32>, vector<32x32xf32>, vector<16x32xf32> -> vector<16x32xf32>
    %6 = vector.shape_cast %5 : vector<16x32xf32> to vector<2x8x32xf32>
    %c0_7 = arith.constant 0 : index
    %c0_8 = arith.constant 0 : index
    %7 = vector.load %arg6[%c0_7, %c0_8] : memref<32x32xf32, #tpu.memory_space<vmem>>, vector<32x32xf32>
    %cst_9 = arith.constant dense<0.000000e+00> : vector<16x32xf32>
    %8 = tpu.matmul %2, %7, %cst_9 {dimension_numbers = #tpu.dot_dimension_numbers<[1], [0], [0], [1], [0, 0, 1, 1], [], []>} : vector<16x32xf32>, vector<32x32xf32>, vector<16x32xf32> -> vector<16x32xf32>
    %9 = vector.shape_cast %8 : vector<16x32xf32> to vector<2x8x32xf32>
    %c0_10 = arith.constant 0 : index
    %c0_11 = arith.constant 0 : index
    %10 = vector.load %arg7[%c0_10, %c0_11] : memref<32x32xf32, #tpu.memory_space<vmem>>, vector<32x32xf32>
    %cst_12 = arith.constant dense<0.000000e+00> : vector<16x32xf32>
    %11 = tpu.matmul %3, %10, %cst_12 {dimension_numbers = #tpu.dot_dimension_numbers<[1], [0], [0], [1], [0, 0, 1, 1], [], []>} : vector<16x32xf32>, vector<32x32xf32>, vector<16x32xf32> -> vector<16x32xf32>
    %12 = vector.shape_cast %11 : vector<16x32xf32> to vector<2x8x32xf32>
    %cst_13 = arith.constant dense<0.000000e+00> : vector<2x8x8xf32>
    %13 = tpu.matmul %0, %6, %cst_13 {dimension_numbers = #tpu.dot_dimension_numbers<[2], [2], [1], [1], [0, 0, 0, 1, 1, 1], [0], [0]>} : vector<2x8x32xf32>, vector<2x8x32xf32>, vector<2x8x8xf32> -> vector<2x8x8xf32>
    %c0_14 = arith.constant 0 : index
    %c0_15 = arith.constant 0 : index
    %14 = vector.load %arg3[%c0_14, %c0_15] : memref<2x8xf32, #tpu.memory_space<vmem>>, vector<2x8xf32>
    %c0_16 = arith.constant 0 : index
    %c0_17 = arith.constant 0 : index
    %15 = vector.load %arg4[%c0_16, %c0_17] : memref<2x8xf32, #tpu.memory_space<vmem>>, vector<2x8xf32>
    %cst_18 = arith.constant dense<0.000000e+00> : vector<2x8x32xf32>
    %16 = tpu.matmul %13, %12, %cst_18 {dimension_numbers = #tpu.dot_dimension_numbers<[2], [1], [1], [2], [0, 0, 0, 1, 1, 2], [0], [0]>} : vector<2x8x8xf32>, vector<2x8x32xf32>, vector<2x8x32xf32> -> vector<2x8x32xf32>
    %17 = arith.addf %9, %16 : vector<2x8x32xf32>
    %18 = math.tanh %17 : vector<2x8x32xf32>
    %c0_19 = arith.constant 0 : index
    %c0_20 = arith.constant 0 : index
    %19 = vector.load %arg8[%c0_19, %c0_20] : memref<1x32xf32, #tpu.memory_space<vmem>>, vector<1x32xf32>
    %20 = vector.shape_cast %19 : vector<1x32xf32> to vector<1x1x32xf32>
    %21 = vector.broadcast %20 : vector<1x1x32xf32> to vector<2x8x32xf32>
    %22 = arith.mulf %18, %21 : vector<2x8x32xf32>
    %cst_21 = arith.constant dense<0.000000e+00> : vector<2x8xf32>
    %23 = vector.multi_reduction <add>, %22, %cst_21 [2] : vector<2x8x32xf32> to vector<2x8xf32>
    %cst_22 = arith.constant 0.000000e+00 : f32
    %24 = vector.broadcast %cst_22 : f32 to vector<2x8xf32>
    %25 = arith.cmpf oeq, %14, %24 : vector<2x8xf32>
    %cst_23 = arith.constant 0xFF800000 : f32
    %26 = vector.broadcast %cst_23 : f32 to vector<2x8xf32>
    %27 = arith.select %25, %26, %23 : vector<2x8xi1>, vector<2x8xf32>
    %cst_24 = arith.constant dense<0xFF800000> : vector<2xf32>
    %28 = vector.multi_reduction <maximumf>, %27, %cst_24 [1] : vector<2x8xf32> to vector<2xf32>
    %29 = vector.shape_cast %28 : vector<2xf32> to vector<2x1xf32>
    %30 = vector.broadcast %29 : vector<2x1xf32> to vector<2x8xf32>
    %31 = arith.subf %27, %30 : vector<2x8xf32>
    %32 = math.exp %31 : vector<2x8xf32>
    %cst_25 = arith.constant dense<0.000000e+00> : vector<2xf32>
    %33 = vector.multi_reduction <add>, %32, %cst_25 [1] : vector<2x8xf32> to vector<2xf32>
    %34 = vector.shape_cast %33 : vector<2xf32> to vector<2x1xf32>
    %35 = tpu.reciprocal %34 : vector<2x1xf32> -> vector<2x1xf32>
    %36 = vector.broadcast %35 : vector<2x1xf32> to vector<2x8xf32>
    %37 = arith.mulf %32, %36 : vector<2x8xf32>
    %c0_26 = arith.constant 0 : index
    %c0_27 = arith.constant 0 : index
    %38 = vector.load %arg10[%c0_26, %c0_27] : memref<2x8xf32, #tpu.memory_space<vmem>>, vector<2x8xf32>
    tpu.vector_store %arg10[%c0_26, %c0_27], %37 {strides = array<i32>} : memref<2x8xf32, #tpu.memory_space<vmem>>, vector<2x8xf32>,
    %cst_28 = arith.constant dense<0.000000e+00> : vector<2x8x32xf32>
    %39 = tpu.matmul %13, %9, %cst_28 {dimension_numbers = #tpu.dot_dimension_numbers<[1], [1], [2], [2], [0, 0, 0, 2, 1, 2], [0], [0]>} : vector<2x8x8xf32>, vector<2x8x32xf32>, vector<2x8x32xf32> -> vector<2x8x32xf32>
    %40 = arith.addf %12, %39 : vector<2x8x32xf32>
    %41 = math.tanh %40 : vector<2x8x32xf32>
    %c0_29 = arith.constant 0 : index
    %c0_30 = arith.constant 0 : index
    %42 = vector.load %arg9[%c0_29, %c0_30] : memref<1x32xf32, #tpu.memory_space<vmem>>, vector<1x32xf32>
    %43 = vector.shape_cast %42 : vector<1x32xf32> to vector<1x1x32xf32>
    %44 = vector.broadcast %43 : vector<1x1x32xf32> to vector<2x8x32xf32>
    %45 = arith.mulf %41, %44 : vector<2x8x32xf32>
    %cst_31 = arith.constant dense<0.000000e+00> : vector<2x8xf32>
    %46 = vector.multi_reduction <add>, %45, %cst_31 [2] : vector<2x8x32xf32> to vector<2x8xf32>
    %cst_32 = arith.constant 0.000000e+00 : f32
    %47 = vector.broadcast %cst_32 : f32 to vector<2x8xf32>
    %48 = arith.cmpf oeq, %15, %47 : vector<2x8xf32>
    %cst_33 = arith.constant 0xFF800000 : f32
    %49 = vector.broadcast %cst_33 : f32 to vector<2x8xf32>
    %50 = arith.select %48, %49, %46 : vector<2x8xi1>, vector<2x8xf32>
    %cst_34 = arith.constant dense<0xFF800000> : vector<2xf32>
    %51 = vector.multi_reduction <maximumf>, %50, %cst_34 [1] : vector<2x8xf32> to vector<2xf32>
    %52 = vector.shape_cast %51 : vector<2xf32> to vector<2x1xf32>
    %53 = vector.broadcast %52 : vector<2x1xf32> to vector<2x8xf32>
    %54 = arith.subf %50, %53 : vector<2x8xf32>
    %55 = math.exp %54 : vector<2x8xf32>
    %cst_35 = arith.constant dense<0.000000e+00> : vector<2xf32>
    %56 = vector.multi_reduction <add>, %55, %cst_35 [1] : vector<2x8xf32> to vector<2xf32>
    %57 = vector.shape_cast %56 : vector<2xf32> to vector<2x1xf32>
    %58 = tpu.reciprocal %57 : vector<2x1xf32> -> vector<2x1xf32>
    %59 = vector.broadcast %58 : vector<2x1xf32> to vector<2x8xf32>
    %60 = arith.mulf %55, %59 : vector<2x8xf32>
    %c0_36 = arith.constant 0 : index
    %c0_37 = arith.constant 0 : index
    %61 = vector.load %arg11[%c0_36, %c0_37] : memref<2x8xf32, #tpu.memory_space<vmem>>, vector<2x8xf32>
    tpu.vector_store %arg11[%c0_36, %c0_37], %60 {strides = array<i32>} : memref<2x8xf32, #tpu.memory_space<vmem>>, vector<2x8xf32>,
    return
  }
  func.func @transform_0(%arg0: i32) -> (i32, i32, i32) {
    %c0_i32 = arith.constant 0 : i32
    %c0_i32_0 = arith.constant 0 : i32
    %c0_i32_1 = arith.constant 0 : i32
    return %arg0, %c0_i32, %c0_i32_0 : i32, i32, i32
  }
  func.func @transform_1(%arg0: i32) -> (i32, i32, i32) {
    %c0_i32 = arith.constant 0 : i32
    %c0_i32_0 = arith.constant 0 : i32
    %c0_i32_1 = arith.constant 0 : i32
    return %arg0, %c0_i32, %c0_i32_0 : i32, i32, i32
  }
  func.func @transform_2(%arg0: i32) -> (i32, i32) {
    %c0_i32 = arith.constant 0 : i32
    %c0_i32_0 = arith.constant 0 : i32
    return %arg0, %c0_i32 : i32, i32
  }
  func.func @transform_3(%arg0: i32) -> (i32, i32) {
    %c0_i32 = arith.constant 0 : i32
    %c0_i32_0 = arith.constant 0 : i32
    return %arg0, %c0_i32 : i32, i32
  }
  func.func @transform_4(%arg0: i32) -> (i32, i32) {
    %c0_i32 = arith.constant 0 : i32
    %c0_i32_0 = arith.constant 0 : i32
    %c0_i32_1 = arith.constant 0 : i32
    return %c0_i32, %c0_i32_0 : i32, i32
  }
  func.func @transform_5(%arg0: i32) -> (i32, i32) {
    %c0_i32 = arith.constant 0 : i32
    %c0_i32_0 = arith.constant 0 : i32
    %c0_i32_1 = arith.constant 0 : i32
    return %c0_i32, %c0_i32_0 : i32, i32
  }
  func.func @transform_6(%arg0: i32) -> (i32, i32) {
    %c0_i32 = arith.constant 0 : i32
    %c0_i32_0 = arith.constant 0 : i32
    %c0_i32_1 = arith.constant 0 : i32
    return %c0_i32, %c0_i32_0 : i32, i32
  }
  func.func @transform_7(%arg0: i32) -> (i32, i32) {
    %c0_i32 = arith.constant 0 : i32
    %c0_i32_0 = arith.constant 0 : i32
    %c0_i32_1 = arith.constant 0 : i32
    return %c0_i32, %c0_i32_0 : i32, i32
  }
  func.func @transform_8(%arg0: i32) -> (i32, i32) {
    %c0_i32 = arith.constant 0 : i32
    %c0_i32_0 = arith.constant 0 : i32
    %c0_i32_1 = arith.constant 0 : i32
    return %c0_i32, %c0_i32_0 : i32, i32
  }
  func.func @transform_9(%arg0: i32) -> (i32, i32) {
    %c0_i32 = arith.constant 0 : i32
    %c0_i32_0 = arith.constant 0 : i32
    return %arg0, %c0_i32 : i32, i32
  }
  func.func @transform_10(%arg0: i32) -> (i32, i32) {
    %c0_i32 = arith.constant 0 : i32
    %c0_i32_0 = arith.constant 0 : i32
    return %arg0, %c0_i32 : i32, i32
  }
}

module attributes {stable_mosaic.version = 11 : i64} {
  func.func @coattention_kernel(%arg0: i32, %arg1: memref<2x8x32xf32, #tpu.memory_space<vmem>>, %arg2: memref<2x8x32xf32, #tpu.memory_space<vmem>>, %arg3: memref<2x8xf32, #tpu.memory_space<vmem>>, %arg4: memref<2x8xf32, #tpu.memory_space<vmem>>, %arg5: memref<32x32xf32, #tpu.memory_space<vmem>>, %arg6: memref<32x32xf32, #tpu.memory_space<vmem>>, %arg7: memref<32x32xf32, #tpu.memory_space<vmem>>, %arg8: memref<1x32xf32, #tpu.memory_space<vmem>>, %arg9: memref<1x32xf32, #tpu.memory_space<vmem>>, %arg10: memref<2x8xf32, #tpu.memory_space<vmem>>, %arg11: memref<2x8xf32, #tpu.memory_space<vmem>>) attributes {dimension_semantics = [#tpu.dimension_semantics<parallel>], iteration_bounds = array<i64: 1>, scalar_prefetch = 0 : i64, scratch_operands = 0 : i64, tpu.core_type = #tpu.core_type<tc>, window_params = [{transform_indices = @transform_0, window_bounds = array<i64: 2, 8, 32>}, {transform_indices = @transform_1, window_bounds = array<i64: 2, 8, 32>}, {transform_indices = @transform_2, window_bounds = array<i64: 2, 8>}, {transform_indices = @transform_3, window_bounds = array<i64: 2, 8>}, {pipeline_mode = #tpu.pipeline_mode<synchronous>, transform_indices = @transform_4, window_bounds = array<i64: 32, 32>}, {pipeline_mode = #tpu.pipeline_mode<synchronous>, transform_indices = @transform_5, window_bounds = array<i64: 32, 32>}, {pipeline_mode = #tpu.pipeline_mode<synchronous>, transform_indices = @transform_6, window_bounds = array<i64: 32, 32>}, {pipeline_mode = #tpu.pipeline_mode<synchronous>, transform_indices = @transform_7, window_bounds = array<i64: 1, 32>}, {pipeline_mode = #tpu.pipeline_mode<synchronous>, transform_indices = @transform_8, window_bounds = array<i64: 1, 32>}, {transform_indices = @transform_9, window_bounds = array<i64: 2, 8>}, {transform_indices = @transform_10, window_bounds = array<i64: 2, 8>}]} {
    %c0 = arith.constant 0 : index
    %c0_0 = arith.constant 0 : index
    %c0_1 = arith.constant 0 : index
    %0 = vector.load %arg1[%c0, %c0_0, %c0_1] : memref<2x8x32xf32, #tpu.memory_space<vmem>>, vector<2x8x32xf32>
    %c0_2 = arith.constant 0 : index
    %c0_3 = arith.constant 0 : index
    %c0_4 = arith.constant 0 : index
    %1 = vector.load %arg2[%c0_2, %c0_3, %c0_4] : memref<2x8x32xf32, #tpu.memory_space<vmem>>, vector<2x8x32xf32>
    %2 = vector.shape_cast %0 : vector<2x8x32xf32> to vector<16x32xf32>
    %3 = vector.shape_cast %1 : vector<2x8x32xf32> to vector<16x32xf32>
    %c0_5 = arith.constant 0 : index
    %c0_6 = arith.constant 0 : index
    %4 = vector.load %arg5[%c0_5, %c0_6] : memref<32x32xf32, #tpu.memory_space<vmem>>, vector<32x32xf32>
    %cst = arith.constant dense<0.000000e+00> : vector<16x32xf32>
    %5 = tpu.matmul %3, %4, %cst {dimension_numbers = #tpu.dot_dimension_numbers<[1], [0], [0], [1], [0, 0, 1, 1], [], []>} : vector<16x32xf32>, vector<32x32xf32>, vector<16x32xf32> -> vector<16x32xf32>
    %6 = vector.shape_cast %5 : vector<16x32xf32> to vector<2x8x32xf32>
    %c0_7 = arith.constant 0 : index
    %c0_8 = arith.constant 0 : index
    %7 = vector.load %arg6[%c0_7, %c0_8] : memref<32x32xf32, #tpu.memory_space<vmem>>, vector<32x32xf32>
    %cst_9 = arith.constant dense<0.000000e+00> : vector<16x32xf32>
    %8 = tpu.matmul %2, %7, %cst_9 {dimension_numbers = #tpu.dot_dimension_numbers<[1], [0], [0], [1], [0, 0, 1, 1], [], []>} : vector<16x32xf32>, vector<32x32xf32>, vector<16x32xf32> -> vector<16x32xf32>
    %9 = vector.shape_cast %8 : vector<16x32xf32> to vector<2x8x32xf32>
    %c0_10 = arith.constant 0 : index
    %c0_11 = arith.constant 0 : index
    %10 = vector.load %arg7[%c0_10, %c0_11] : memref<32x32xf32, #tpu.memory_space<vmem>>, vector<32x32xf32>
    %cst_12 = arith.constant dense<0.000000e+00> : vector<16x32xf32>
    %11 = tpu.matmul %3, %10, %cst_12 {dimension_numbers = #tpu.dot_dimension_numbers<[1], [0], [0], [1], [0, 0, 1, 1], [], []>} : vector<16x32xf32>, vector<32x32xf32>, vector<16x32xf32> -> vector<16x32xf32>
    %12 = vector.shape_cast %11 : vector<16x32xf32> to vector<2x8x32xf32>
    %cst_13 = arith.constant dense<0.000000e+00> : vector<2x8x8xf32>
    %13 = tpu.matmul %0, %6, %cst_13 {dimension_numbers = #tpu.dot_dimension_numbers<[2], [2], [1], [1], [0, 0, 0, 1, 1, 1], [0], [0]>} : vector<2x8x32xf32>, vector<2x8x32xf32>, vector<2x8x8xf32> -> vector<2x8x8xf32>
    %c0_14 = arith.constant 0 : index
    %c0_15 = arith.constant 0 : index
    %14 = vector.load %arg3[%c0_14, %c0_15] : memref<2x8xf32, #tpu.memory_space<vmem>>, vector<2x8xf32>
    %c0_16 = arith.constant 0 : index
    %c0_17 = arith.constant 0 : index
    %15 = vector.load %arg4[%c0_16, %c0_17] : memref<2x8xf32, #tpu.memory_space<vmem>>, vector<2x8xf32>
    %cst_18 = arith.constant dense<0.000000e+00> : vector<2x8x32xf32>
    %16 = tpu.matmul %13, %12, %cst_18 {dimension_numbers = #tpu.dot_dimension_numbers<[2], [1], [1], [2], [0, 0, 0, 1, 1, 2], [0], [0]>} : vector<2x8x8xf32>, vector<2x8x32xf32>, vector<2x8x32xf32> -> vector<2x8x32xf32>
    %17 = arith.addf %9, %16 : vector<2x8x32xf32>
    %18 = math.tanh %17 : vector<2x8x32xf32>
    %c0_19 = arith.constant 0 : index
    %c0_20 = arith.constant 0 : index
    %19 = vector.load %arg8[%c0_19, %c0_20] : memref<1x32xf32, #tpu.memory_space<vmem>>, vector<1x32xf32>
    %20 = vector.shape_cast %19 : vector<1x32xf32> to vector<1x1x32xf32>
    %21 = vector.broadcast %20 : vector<1x1x32xf32> to vector<2x8x32xf32>
    %22 = arith.mulf %18, %21 : vector<2x8x32xf32>
    %cst_21 = arith.constant dense<0.000000e+00> : vector<2x8xf32>
    %23 = vector.multi_reduction <add>, %22, %cst_21 [2] : vector<2x8x32xf32> to vector<2x8xf32>
    %cst_22 = arith.constant 0.000000e+00 : f32
    %24 = vector.broadcast %cst_22 : f32 to vector<2x8xf32>
    %25 = arith.cmpf oeq, %14, %24 : vector<2x8xf32>
    %cst_23 = arith.constant 0xFF800000 : f32
    %26 = vector.broadcast %cst_23 : f32 to vector<2x8xf32>
    %27 = arith.select %25, %26, %23 : vector<2x8xi1>, vector<2x8xf32>
    %cst_24 = arith.constant dense<0xFF800000> : vector<2xf32>
    %28 = vector.multi_reduction <maximumf>, %27, %cst_24 [1] : vector<2x8xf32> to vector<2xf32>
    %29 = vector.shape_cast %28 : vector<2xf32> to vector<2x1xf32>
    %30 = vector.broadcast %29 : vector<2x1xf32> to vector<2x8xf32>
    %31 = arith.subf %27, %30 : vector<2x8xf32>
    %32 = math.exp %31 : vector<2x8xf32>
    %cst_25 = arith.constant dense<0.000000e+00> : vector<2xf32>
    %33 = vector.multi_reduction <add>, %32, %cst_25 [1] : vector<2x8xf32> to vector<2xf32>
    %34 = vector.shape_cast %33 : vector<2xf32> to vector<2x1xf32>
    %35 = tpu.reciprocal %34 : vector<2x1xf32> -> vector<2x1xf32>
    %36 = vector.broadcast %35 : vector<2x1xf32> to vector<2x8xf32>
    %37 = arith.mulf %32, %36 : vector<2x8xf32>
    %c0_26 = arith.constant 0 : index
    %c0_27 = arith.constant 0 : index
    %38 = vector.load %arg10[%c0_26, %c0_27] : memref<2x8xf32, #tpu.memory_space<vmem>>, vector<2x8xf32>
    tpu.vector_store %arg10[%c0_26, %c0_27], %37 {strides = array<i32>} : memref<2x8xf32, #tpu.memory_space<vmem>>, vector<2x8xf32>,
    %cst_28 = arith.constant dense<0.000000e+00> : vector<2x8x32xf32>
    %39 = tpu.matmul %13, %9, %cst_28 {dimension_numbers = #tpu.dot_dimension_numbers<[1], [1], [2], [2], [0, 0, 0, 2, 1, 2], [0], [0]>} : vector<2x8x8xf32>, vector<2x8x32xf32>, vector<2x8x32xf32> -> vector<2x8x32xf32>
    %40 = arith.addf %12, %39 : vector<2x8x32xf32>
    %41 = math.tanh %40 : vector<2x8x32xf32>
    %c0_29 = arith.constant 0 : index
    %c0_30 = arith.constant 0 : index
    %42 = vector.load %arg9[%c0_29, %c0_30] : memref<1x32xf32, #tpu.memory_space<vmem>>, vector<1x32xf32>
    %43 = vector.shape_cast %42 : vector<1x32xf32> to vector<1x1x32xf32>
    %44 = vector.broadcast %43 : vector<1x1x32xf32> to vector<2x8x32xf32>
    %45 = arith.mulf %41, %44 : vector<2x8x32xf32>
    %cst_31 = arith.constant dense<0.000000e+00> : vector<2x8xf32>
    %46 = vector.multi_reduction <add>, %45, %cst_31 [2] : vector<2x8x32xf32> to vector<2x8xf32>
    %cst_32 = arith.constant 0.000000e+00 : f32
    %47 = vector.broadcast %cst_32 : f32 to vector<2x8xf32>
    %48 = arith.cmpf oeq, %15, %47 : vector<2x8xf32>
    %cst_33 = arith.constant 0xFF800000 : f32
    %49 = vector.broadcast %cst_33 : f32 to vector<2x8xf32>
    %50 = arith.select %48, %49, %46 : vector<2x8xi1>, vector<2x8xf32>
    %cst_34 = arith.constant dense<0xFF800000> : vector<2xf32>
    %51 = vector.multi_reduction <maximumf>, %50, %cst_34 [1] : vector<2x8xf32> to vector<2xf32>
    %52 = vector.shape_cast %51 : vector<2xf32> to vector<2x1xf32>
    %53 = vector.broadcast %52 : vector<2x1xf32> to vector<2x8xf32>
    %54 = arith.subf %50, %53 : vector<2x8xf32>
    %55 = math.exp %54 : vector<2x8xf32>
    %cst_35 = arith.constant dense<0.000000e+00> : vector<2xf32>
    %56 = vector.multi_reduction <add>, %55, %cst_35 [1] : vector<2x8xf32> to vector<2xf32>
    %57 = vector.shape_cast %56 : vector<2xf32> to vector<2x1xf32>
    %58 = tpu.reciprocal %57 : vector<2x1xf32> -> vector<2x1xf32>
    %59 = vector.broadcast %58 : vector<2x1xf32> to vector<2x8xf32>
    %60 = arith.mulf %55, %59 : vector<2x8xf32>
    %c0_36 = arith.constant 0 : index
    %c0_37 = arith.constant 0 : index
    %61 = vector.load %arg11[%c0_36, %c0_37] : memref<2x8xf32, #tpu.memory_space<vmem>>, vector<2x8xf32>
    tpu.vector_store %arg11[%c0_36, %c0_37], %60 {strides = array<i32>} : memref<2x8xf32, #tpu.memory_space<vmem>>, vector<2x8xf32>,
    return
  }
  func.func @transform_0(%arg0: i32) -> (i32, i32, i32) {
    %c0_i32 = arith.constant 0 : i32
    %c0_i32_0 = arith.constant 0 : i32
    %c0_i32_1 = arith.constant 0 : i32
    return %arg0, %c0_i32, %c0_i32_0 : i32, i32, i32
  }
  func.func @transform_1(%arg0: i32) -> (i32, i32, i32) {
    %c0_i32 = arith.constant 0 : i32
    %c0_i32_0 = arith.constant 0 : i32
    %c0_i32_1 = arith.constant 0 : i32
    return %arg0, %c0_i32, %c0_i32_0 : i32, i32, i32
  }
  func.func @transform_2(%arg0: i32) -> (i32, i32) {
    %c0_i32 = arith.constant 0 : i32
    %c0_i32_0 = arith.constant 0 : i32
    return %arg0, %c0_i32 : i32, i32
  }
  func.func @transform_3(%arg0: i32) -> (i32, i32) {
    %c0_i32 = arith.constant 0 : i32
    %c0_i32_0 = arith.constant 0 : i32
    return %arg0, %c0_i32 : i32, i32
  }
  func.func @transform_4(%arg0: i32) -> (i32, i32) {
    %c0_i32 = arith.constant 0 : i32
    %c0_i32_0 = arith.constant 0 : i32
    %c0_i32_1 = arith.constant 0 : i32
    return %c0_i32, %c0_i32_0 : i32, i32
  }
  func.func @transform_5(%arg0: i32) -> (i32, i32) {
    %c0_i32 = arith.constant 0 : i32
    %c0_i32_0 = arith.constant 0 : i32
    %c0_i32_1 = arith.constant 0 : i32
    return %c0_i32, %c0_i32_0 : i32, i32
  }
  func.func @transform_6(%arg0: i32) -> (i32, i32) {
    %c0_i32 = arith.constant 0 : i32
    %c0_i32_0 = arith.constant 0 : i32
    %c0_i32_1 = arith.constant 0 : i32
    return %c0_i32, %c0_i32_0 : i32, i32
  }
  func.func @transform_7(%arg0: i32) -> (i32, i32) {
    %c0_i32 = arith.constant 0 : i32
    %c0_i32_0 = arith.constant 0 : i32
    %c0_i32_1 = arith.constant 0 : i32
    return %c0_i32, %c0_i32_0 : i32, i32
  }
  func.func @transform_8(%arg0: i32) -> (i32, i32) {
    %c0_i32 = arith.constant 0 : i32
    %c0_i32_0 = arith.constant 0 : i32
    %c0_i32_1 = arith.constant 0 : i32
    return %c0_i32, %c0_i32_0 : i32, i32
  }
  func.func @transform_9(%arg0: i32) -> (i32, i32) {
    %c0_i32 = arith.constant 0 : i32
    %c0_i32_0 = arith.constant 0 : i32
    return %arg0, %c0_i32 : i32, i32
  }
  func.func @transform_10(%arg0: i32) -> (i32, i32) {
    %c0_i32 = arith.constant 0 : i32
    %c0_i32_0 = arith.constant 0 : i32
    return %arg0, %c0_i32 : i32, i32
  }
}

</mosaic_0001>

<bundles_post_ra>
// kernel: tpu_custom_call.1
= control target key start
LH: loop header
LB: loop body
LE: loop exit
PB: predicated region body
PF: predicated region fallthrough
CT: control target
= control target key end

     0   :  { %16 = vsyncpa [#allocation3], 0  ;;  %s1533_s0 = inlined_call_operand.hbm [shape: f32[2,8,32], index: 0, kind: input, shape index: {}]   ;;  %s1534_s1 = inlined_call_operand.hbm [shape: f32[2,8,32], index: 1, kind: input, shape index: {}]   ;;  %s1535_s2 = inlined_call_operand.vmem [shape: f32[2,8], index: 2, kind: input, shape index: {}]   ;;  %s1536_s3 = inlined_call_operand.vmem [shape: f32[2,8], index: 3, kind: input, shape index: {}]   ;;  %s1537_s4 = inlined_call_operand.hbm [shape: f32[32,32], index: 4, kind: input, shape index: {}]   ;;  %s1538_s5 = inlined_call_operand.hbm [shape: f32[32,32], index: 5, kind: input, shape index: {}]   ;;  %s1539_s6 = inlined_call_operand.hbm [shape: f32[32,32], index: 6, kind: input, shape index: {}]   ;;  %s1540_s7 = inlined_call_operand.vmem [shape: f32[1,32], index: 7, kind: input, shape index: {}]   ;;  %s1541_s8 = inlined_call_operand.vmem [shape: f32[1,32], index: 8, kind: input, shape index: {}]   ;;  %s1542_s9 = inlined_call_operand.hbm [shape: f32[2,8], index: 9, kind: output, shape index: {0}]   ;;  %s1543_s10 = inlined_call_operand.hbm [shape: f32[2,8], index: 10, kind: output, shape index: {1}]  }
   0x1   :  { %17 = vsyncpa [#allocation6], 0 }
   0x2   :  { %18 = vsyncpa [#allocation9], 0 }
   0x3   :  { %19 = vsyncpa [#allocation4], 0 }
   0x4   :  { %20 = vsyncpa [#allocation13], 0  ;;  %s1312_s13 = smov [#allocation5]   ;;  %s1313_s15 = smov [#allocation8]  }
   0x5   :  { %s38_s14 = sshll.u32 %s1312_s13, 4  ;;  %s66_s16 = sshll.u32 %s1313_s15, 4  ;;  %s39_s14 = int_to_ptr.vmem [resolvable:$true] %s38_s14  ;;  %s1378_s16 = int_to_ptr.vmem [resolvable:$true] %s66_s16 }
   0x6   :  { %s1148_s19 = scalar_lea.hbm %s1534_s1, 256 }
   0x7   :  { %p1149_p0 = scmp.ne.s32.totalorder %s1534_s1, %s1148_s19  ;;  %p1152_p1 = scmp.lt.u32.totalorder %s1148_s19, %s1534_s1 }
   0x9   :  { %p1154_p2 = pnand %p1152_p1, %p1149_p0 }
   0xb   :  { %1157 = shalt.err (!%p1154_p2)
}
   0xc   :  { %s1158_s24 = scalar_lea.vmem %s39_s14, 256  ;;  %p1163_p4 = scmp.lt.s32.totalorder %s39_s14, %s39_s14 }
   0xd   :  { %p1159_p3 = scmp.ne.s32.totalorder %s39_s14, %s1158_s24  ;;  %p1164_p5 = scmp.lt.s32.totalorder %s1158_s24, %s1158_s24 }
   0xf   :  { %p1165_p6 = por %p1164_p5, %p1163_p4 }
  0x11   :  { %p1166_p7 = pnand %p1165_p6, %p1159_p3 }
  0x13   :  { %1169 = shalt.err (!%p1166_p7)
}
  0x14   :  { %s1314_s25 = smov 128   ;;  %s1315_s26 = smov 8  }
  0x15   :  { %44 = dma.hbm_to_vmem [thread:$0]  %s1534_s1, 256, %s39_s14, [#allocation6], %s1314_s25, %s1314_s25, %s1315_s26  }
  0x16   :  { %s1170_s11 = scalar_lea.hbm %s1538_s5, 512 }
  0x17   :  { %p1171_p8 = scmp.ne.s32.totalorder %s1538_s5, %s1170_s11  ;;  %p1174_p9 = scmp.lt.u32.totalorder %s1170_s11, %s1538_s5 }
  0x19   :  { %p1176_p10 = pnand %p1174_p9, %p1171_p8 }
  0x1b   :  { %1179 = shalt.err (!%p1176_p10)
}
  0x1c   :  { %s1180_s18 = scalar_lea.vmem %s1378_s16, 512  ;;  %p1185_p12 = scmp.lt.s32.totalorder %s1378_s16, %s1378_s16 }
  0x1d   :  { %p1181_p11 = scmp.ne.s32.totalorder %s1378_s16, %s1180_s18  ;;  %p1186_p13 = scmp.lt.s32.totalorder %s1180_s18, %s1180_s18 }
  0x1f   :  { %p1187_p0 = por %p1186_p13, %p1185_p12 }
  0x21   :  { %p1188_p1 = pnand %p1187_p0, %p1181_p11 }
  0x23   :  { %1191 = shalt.err (!%p1188_p1)
}
  0x24   :  { %72 = dma.hbm_to_vmem [thread:$0]  %s1538_s5, 512, %s1378_s16, [#allocation9], %s1314_s25, %s1314_s25, %s1315_s26  }
  0x25   :  { %s1316_s19 = smov [#allocation2]   ;;  %s1317_s21 = smov [#allocation7]  }
  0x26   :  { %s26_s20 = sshll.u32 %s1316_s19, 4  ;;  %s54_s22 = sshll.u32 %s1317_s21, 4  ;;  %s27_s20 = int_to_ptr.vmem [resolvable:$true] %s26_s20  ;;  %s1415_s22 = int_to_ptr.vmem [resolvable:$true] %s54_s22 }
  0x27   :  { %s1192_s27 = scalar_lea.hbm %s1533_s0, 256 }
  0x28   :  { %p1193_p2 = scmp.ne.s32.totalorder %s1533_s0, %s1192_s27  ;;  %p1196_p3 = scmp.lt.u32.totalorder %s1192_s27, %s1533_s0 }
  0x2a   :  { %p1198_p4 = pnand %p1196_p3, %p1193_p2 }
  0x2c   :  { %1201 = shalt.err (!%p1198_p4)
}
  0x2d   :  { %s1202_s5 = scalar_lea.vmem %s27_s20, 256  ;;  %p1207_p6 = scmp.lt.s32.totalorder %s27_s20, %s27_s20 }
  0x2e   :  { %p1203_p5 = scmp.ne.s32.totalorder %s27_s20, %s1202_s5  ;;  %p1208_p7 = scmp.lt.s32.totalorder %s1202_s5, %s1202_s5 }
  0x30   :  { %p1209_p8 = por %p1208_p7, %p1207_p6 }
  0x32   :  { %p1210_p9 = pnand %p1209_p8, %p1203_p5 }
  0x34   :  { %1213 = shalt.err (!%p1210_p9)
}
  0x35   :  { %32 = dma.hbm_to_vmem [thread:$0]  %s1533_s0, 256, %s27_s20, [#allocation3], %s1314_s25, %s1314_s25, %s1315_s26  }
  0x36   :  { %s1214_s17 = scalar_lea.hbm %s1537_s4, 512 }
  0x37   :  { %p1215_p10 = scmp.ne.s32.totalorder %s1537_s4, %s1214_s17  ;;  %p1218_p11 = scmp.lt.u32.totalorder %s1214_s17, %s1537_s4 }
  0x39   :  { %p1220_p12 = pnand %p1218_p11, %p1215_p10 }
  0x3b   :  { %1223 = shalt.err (!%p1220_p12)
}
  0x3c   :  { %s1224_s21 = scalar_lea.vmem %s1415_s22, 512  ;;  %p1229_p0 = scmp.lt.s32.totalorder %s1415_s22, %s1415_s22 }
  0x3d   :  { %p1225_p13 = scmp.ne.s32.totalorder %s1415_s22, %s1224_s21  ;;  %p1230_p1 = scmp.lt.s32.totalorder %s1224_s21, %s1224_s21 }
  0x3f   :  { %p1231_p2 = por %p1230_p1, %p1229_p0 }
  0x41   :  { %p1232_p3 = pnand %p1231_p2, %p1225_p13 }
  0x43   :  { %1235 = shalt.err (!%p1232_p3)
}
  0x44   :  { %60 = dma.hbm_to_vmem [thread:$0]  %s1537_s4, 512, %s1415_s22, [#allocation6], %s1314_s25, %s1314_s25, %s1315_s26  }
  0x45   :  { %s1318_s23 = smov [#allocation10]   ;;  %s1236_s29 = scalar_lea.hbm %s1539_s6, 512 }
  0x46   :  { %s78_s24 = sshll.u32 %s1318_s23, 4  ;;  %p1237_p4 = scmp.ne.s32.totalorder %s1539_s6, %s1236_s29  ;;  %s79_s24 = int_to_ptr.vmem [resolvable:$true] %s78_s24 }
  0x47   :  { %p1240_p5 = scmp.lt.u32.totalorder %s1236_s29, %s1539_s6 }
  0x49   :  { %p1242_p6 = pnand %p1240_p5, %p1237_p4 }
  0x4b   :  { %1245 = shalt.err (!%p1242_p6)
}
  0x4c   :  { %s1246_s12 = scalar_lea.vmem %s79_s24, 512  ;;  %p1251_p8 = scmp.lt.s32.totalorder %s79_s24, %s79_s24 }
  0x4d   :  { %p1247_p7 = scmp.ne.s32.totalorder %s79_s24, %s1246_s12  ;;  %p1252_p9 = scmp.lt.s32.totalorder %s1246_s12, %s1246_s12 }
  0x4f   :  { %p1253_p10 = por %p1252_p9, %p1251_p8 }
  0x51   :  { %p1254_p11 = pnand %p1253_p10, %p1247_p7 }
  0x53   :  { %1257 = shalt.err (!%p1254_p11)
}
  0x54   :  { %84 = dma.hbm_to_vmem [thread:$0]  %s1539_s6, 512, %s79_s24, [#allocation9], %s1314_s25, %s1314_s25, %s1315_s26  }
  0x55   :  { %1302 = dma.done.wait [#allocation3], 256  }
  0x56   :  { %1303 = vsyncadd [#allocation3], 4294967040 }
  0x57   :  { %1304 = dma.done.wait [#allocation6], 768  }
  0x58   :  { %1305 = vsyncadd [#allocation6], 4294966528 }
  0x59   :  { %1306 = dma.done.wait [#allocation9], 1024  }
  0x5a   :  { %1307 = vsyncadd [#allocation9], 4294966272  ;;  %vm112_vm0 = vcmask 261120   ;;  %v108_v0 = vld [vmem:[#allocation7] sm:$0xff]  ;;  %v109_v1 = vld [vmem:[#allocation7 + $0x8] sm:$0xff]  ;;  %v1319_v22 = vmov 0.0   ;;  %v675_v61 = vlaneseq }
  0x5b   :  { %v110_v2 = vld [vmem:[#allocation7 + $0x10] sm:$0xff]  ;;  %v1097_v3 = vpack.c.bf16 %v109_v1, %v108_v0  ;;  %v111_v4 = vld [vmem:[#allocation7 + $0x18] sm:$0xff]  ;;  %v194_v7 = vld [vmem:[#allocation8] sm:$0xff]  ;;  %vm1320_vm1 = vmmov 0   ;;  %vm506_vm2 = vcmask 64512   ;;  %vm685_vm3 = vcmask 1041409  }
  0x5c   :  { %v106_v5 = vld [vmem:[#allocation5] sm:$0xff]  ;;  %v1101_v6 = vpack.c.bf16 %v111_v4, %v110_v2  ;;  %v195_v8 = vld [vmem:[#allocation8 + $0x8] sm:$0xff]  ;;  %v197_v11 = vld [vmem:[#allocation8 + $0x18] sm:$0xff]  ;;  %v676_v62 = vand.u32 127, %v675_v61  ;;  %v678_v63 = vshrl.u32 %v675_v61, 7  ;;  %vm689_vm5 = vcmask 58368  }
  0x5d   :  { %1042 = vmatprep.mubr.msk.f32.mxu0 %vm112_vm0, %v106_v5  ;;  %v196_v9 = vld [vmem:[#allocation8 + $0x10] sm:$0xff]  ;;  %1098 = vmatprep.subr.bf16.mxu0 %v1097_v3  ;;  %v1105_v10 = vpack.c.bf16 %v195_v8, %v194_v7  ;;  %v279_v12 = vld [vmem:[#allocation10] sm:$0xff]  ;;  %v280_v13 = vld [vmem:[#allocation10 + $0x8] sm:$0xff] }
  0x5e   :  { %1100 = vmatpush3.bf16.msra.mxu0 %v1097_v3  ;;  %v1109_v14 = vpack.c.bf16 %v197_v11, %v196_v9  ;;  %v1113_v15 = vpack.c.bf16 %v280_v13, %v279_v12  ;;  %v281_v16 = vld [vmem:[#allocation10 + $0x10] sm:$0xff]  ;;  %v282_v17 = vld [vmem:[#allocation10 + $0x18] sm:$0xff]  ;;  %v104_v20 = vld [vmem:[#allocation2] sm:$0xff]  ;;  %v679_v1 = vsub.s32 %v676_v62, %v678_v63 }
  0x5f   :  { %1102 = vmatprep.subr.bf16.mxu0 %v1101_v6  ;;  %1106 = vmatprep.subr.bf16.mxu1 %v1105_v10  ;;  %v107_v18 = vld [vmem:[#allocation5 + $0x8] sm:$0xff]  ;;  %v1117_v19 = vpack.c.bf16 %v282_v17, %v281_v16  ;;  %v105_v21 = vld [vmem:[#allocation2 + $0x8] sm:$0xff]  ;;  %v1000_v41 = vld [vmem:[%s1540_s7] ss:$0 sm:$0xff] }
  0x60   :  { %1108 = vmatpush3.bf16.msra.mxu1 %v1105_v10  ;;  %1053 = vmatprep.mubr.msk.f32.mxu1 %vm112_vm0, %v104_v20  ;;  %v1003_v54 = vld [vmem:[%s1541_s8] ss:$0 sm:$0xff] }
  0x61   :  { %1110 = vmatprep.subr.bf16.mxu1 %v1109_v14  ;;  %v504_v2 = vld [vmem:[%s1535_s2] sm:$0x3]  ;;  %s1321_s2 = smov [#allocation11]  }
  0x62   :  { %1104 = vmatpush3.bf16.msra.mxu0 %v1101_v6  ;;  %vm672_vm4 = vcmp.eq.f32.partialorder %v504_v2, 0.0  ;;  %v505_v10 = vld [vmem:[%s1536_s3] sm:$0x3]  ;;  %s963_s3 = sshll.u32 %s1321_s2, 4  ;;  %s964_s3 = int_to_ptr.vmem [resolvable:$true] %s963_s3 }
  0x63   :  { %1114 = vmatprep.subr.bf16.mxu0 %v1113_v15  ;;  %vm931_vm6 = vcmp.eq.f32.partialorder %v505_v10, 0.0  ;;  %s1258_s18 = scalar_lea.vmem %s964_s3, 32  ;;  %p1263_p13 = scmp.lt.s32.totalorder %s964_s3, %s964_s3 }
  0x64   :  { %1112 = vmatpush3.bf16.msra.mxu1 %v1109_v14  ;;  %p1259_p12 = scmp.ne.s32.totalorder %s964_s3, %s1258_s18  ;;  %p1264_p0 = scmp.lt.s32.totalorder %s1258_s18, %s1258_s18 }
  0x65   :  { %1043 = vmatmul.mubr.msk.f32.vlgmr.msra.gmra.mrb[0].mxu0 %vm112_vm0, %v107_v18  ;;  %1067 = vmatprep.subr.mxu1 %v1319_v22 }
  0x66   :  { %1116 = vmatpush3.bf16.msra.mxu0 %v1113_v15  ;;  %1064 = vmatprep.mubr.msk.f32.mxu0 %vm112_vm0, %v106_v5  ;;  %p1265_p1 = por %p1264_p0, %p1263_p13 }
  0x67   :  { %1118 = vmatprep.subr.bf16.mxu0 %v1117_v19  ;;  %1054 = vmatmul.mubr.msk.f32.vlgmr.msra.gmra.mrb[0].mxu1 %vm112_vm0, %v105_v21 }
  0x68   :  { %1069 = vmatprep.mubr.msk.f32.mxu1 %vm1320_vm1, %v1319_v22  ;;  %p1266_p2 = pnand %p1265_p1, %p1259_p12 }
  0x6a   :  { %1120 = vmatpush3.bf16.msra.mxu0 %v1117_v19 }
  0x6b   :  { %1077 = vmatprep.subr.mxu0 %v1319_v22 }
  0x6d   :  { %1065 = vmatmul.mubr.msk.f32.vlgmr.msra.gmra.mrb[2].mxu0 %vm112_vm0, %v107_v18 }
  0x6e   :  { %1079 = vmatprep.mubr.msk.f32.mxu0 %vm1320_vm1, %v1319_v22 }
 0x138   :  { %v1044_v23 = vpop.f32.mrb[0].mxu0 }
 0x139   :  { %v185_v24 = vpop.f32.mrb[1].mxu0 }
 0x13a   :  { %1068 = vmatpush3.xpose.msk.msra.mxu1 %vm112_vm0, %v185_v24  ;;  %v1055_v27 = vpop.f32.mrb[0].mxu1 }
 0x13b   :  { %1072 = vmatprep.subr.mxu1 %v1319_v22  ;;  %v270_v28 = vpop.f32.mrb[1].mxu1 }
 0x13d   :  { %1070 = vmatmul.mubr.msk.f32.vlgmr.msra.gmra.mrb[2].mxu1 %vm112_vm0, %v104_v20 }
 0x13e   :  { %1073 = vmatpush3.xpose.msk.msra.mxu1 %vm112_vm0, %v1044_v23  ;;  %1074 = vmatprep.mubr.msk.f32.mxu1 %vm1320_vm1, %v1319_v22 }
 0x13f   :  { %1082 = vmatprep.subr.mxu1 %v1319_v22 }
 0x140   :  { %v1066_v25 = vpop.f32.mrb[2].mxu0 }
 0x141   :  { %1075 = vmatmul.mubr.msk.f32.vlgmr.msra.gmra.mrb[4].mxu1 %vm112_vm0, %v105_v21  ;;  %v349_v26 = vpop.f32.mrb[3].mxu0 }
 0x142   :  { %1078 = vmatpush3.msra.mxu0 %v349_v26  ;;  %1083 = vmatpush3.msra.mxu1 %v1066_v25 }
 0x143   :  { %1087 = vmatprep.subr.mxu0 %v1319_v22  ;;  %1084 = vmatprep.mubr.msk.f32.mxu1 %vm1320_vm1, %v1319_v22 }
 0x144   :  { %1092 = vmatprep.subr.mxu1 %v1319_v22 }
 0x210   :  { %v427_v29 = vpop.f32.mrb[2].mxu1 }
 0x211   :  { %702 = vxpose.xlu0.b32.start.end [1/1] (short) (narrow) %v427_v29, 8  ;;  %v1071_v30 = vpop.f32.mrb[3].mxu1  ;;  %1080 = vmatmul.mubr.msk.f32.vlgmr.msra.gmra.mrb[4].mxu0 %vm506_vm2, %v427_v29 }
 0x212   :  { %1088 = vmatpush3.msra.mxu0 %v270_v28  ;;  %1089 = vmatprep.mubr.msk.f32.mxu0 %vm1320_vm1, %v1319_v22 }
 0x214   :  { %v500_v31 = vpop.f32.mrb[4].mxu1 }
 0x215   :  { %807 = vxpose.xlu0.b32.start.end [1/1] (short) (narrow) %v500_v31, 8  ;;  %v1076_v32 = vpop.f32.mrb[5].mxu1  ;;  %1085 = vmatmul.mubr.msk.f32.vlgmr.msra.gmra.mrb[6].mxu1 %vm506_vm2, %v500_v31 }
 0x216   :  { %1093 = vmatpush3.msra.mxu1 %v1055_v27  ;;  %1094 = vmatprep.mubr.msk.f32.mxu1 %vm1320_vm1, %v1319_v22 }
 0x291   :  { %v718_v33 = vpop.trf.xlu0 }
 0x292   :  { %1090 = vmatmul.mubr.msk.f32.vlgmr.msra.gmra.mrb[6].mxu0 %vm506_vm2, %v718_v33 }
 0x295   :  { %v823_v34 = vpop.trf.xlu0 }
 0x296   :  { %1095 = vmatmul.mubr.msk.f32.vlgmr.msra.gmra.mrb[8].mxu1 %vm506_vm2, %v823_v34 }
 0x2e4   :  { %v576_v35 = vpop.f32.mrb[4].mxu0 }
 0x2e5   :  { %v653_v36 = vadd.f32 %v576_v35, %v270_v28  ;;  %v1081_v37 = vpop.f32.mrb[5].mxu0 }
 0x2e7   :  { %1132 = vtanh.f32 %v653_v36 }
 0x2e8   :  { %v649_v38 = vpop.f32.mrb[6].mxu1 }
 0x2e9   :  { %v654_v39 = vadd.f32 %v1055_v27, %v649_v38  ;;  %v1086_v40 = vpop.f32.mrb[7].mxu1 }
 0x2eb   :  { %1134 = vtanh.f32 %v654_v39 }
 0x2f1   :  { %v1133_v42 = vpop.eup %1132 }
 0x2f2   :  { %v664_v43 = vmul.f32 %v1133_v42, %v1000_v41 }
 0x2f4   :  { %v666_v44 = vsel %vm112_vm0, %v664_v43, 0.0 }
 0x2f5   :  { %v1135_v45 = vpop.eup %1134  ;;  %667 = vadd.xlane.f32.xlu1 %v666_v44 }
 0x2f6   :  { %v665_v46 = vmul.f32 %v1135_v45, %v1000_v41 }
 0x2f8   :  { %v669_v47 = vsel %vm112_vm0, %v665_v46, 0.0 }
 0x2f9   :  { %670 = vadd.xlane.f32.xlu1 %v669_v47 }
 0x365   :  { %v803_v48 = vpop.f32.mrb[6].mxu0 }
 0x366   :  { %v912_v49 = vadd.f32 %v803_v48, %v349_v26  ;;  %v1091_v50 = vpop.f32.mrb[7].mxu0 }
 0x368   :  { %1136 = vtanh.f32 %v912_v49 }
 0x369   :  { %v908_v51 = vpop.f32.mrb[8].mxu1 }
 0x36a   :  { %v913_v52 = vadd.f32 %v1066_v25, %v908_v51  ;;  %v1096_v53 = vpop.f32.mrb[9].mxu1 }
 0x36c   :  { %1138 = vtanh.f32 %v913_v52 }
 0x372   :  { %v1137_v55 = vpop.eup %1136 }
 0x373   :  { %v923_v56 = vmul.f32 %v1137_v55, %v1003_v54 }
 0x375   :  { %v925_v57 = vsel %vm112_vm0, %v923_v56, 0.0 }
 0x376   :  { %v1139_v58 = vpop.eup %1138  ;;  %926 = vadd.xlane.f32.xlu0 %v925_v57 }
 0x377   :  { %v924_v59 = vmul.f32 %v1139_v58, %v1003_v54 }
 0x379   :  { %v928_v60 = vsel %vm112_vm0, %v924_v59, 0.0 }
 0x37a   :  { %929 = vadd.xlane.f32.xlu1 %v928_v60 }
 0x382   :  { %v668_v0 = vpop.xlane.xlu1 %667 }
 0x383   :  { %v680_v4 = vrot.slane %v668_v0, %v679_v1 }
 0x386   :  { %v671_v3 = vpop.xlane.xlu1 %670 }
 0x387   :  { %v684_v5 = vrot.slane %v671_v3, %v679_v1 }
 0x389   :  { %v686_v6 = vsel %vm685_vm3, %v684_v5, %v680_v4 }
 0x38a   :  { %v688_v7 = vsel %vm672_vm4, -inf, %v686_v6 }
 0x38b   :  { %v690_v8 = vsel %vm689_vm5, %v688_v7, -inf }
 0x38c   :  { %691 = vmax.xlane.f32.xlu1 %v690_v8 }
 0x403   :  { %v927_v9 = vpop.xlane.xlu0 %926 }
 0x404   :  { %v937_v12 = vrot.slane %v927_v9, %v679_v1 }
 0x407   :  { %v930_v11 = vpop.xlane.xlu1 %929 }
 0x408   :  { %v941_v13 = vrot.slane %v930_v11, %v679_v1 }
 0x40a   :  { %v942_v14 = vsel %vm685_vm3, %v941_v13, %v937_v12 }
 0x40b   :  { %v944_v15 = vsel %vm931_vm6, -inf, %v942_v14 }
 0x40c   :  { %v945_v16 = vsel %vm689_vm5, %v944_v15, -inf }
 0x40d   :  { %946 = vmax.xlane.f32.xlu1 %v945_v16 }
 0x419   :  { %v692_v17 = vpop.xlane.xlu1 %691 }
 0x41a   :  { %v693_v18 = vsub.f32 %v688_v7, %v692_v17 }
 0x41c   :  { %v694_v19 = vmul.f32 1.442695, %v693_v18 }
 0x41e   :  { %1140 = vpow2.f32 %v694_v19 }
 0x428   :  { %v1141_v20 = vpop.eup %1140 }
 0x429   :  { %v696_v21 = vsel %vm689_vm5, %v1141_v20, 0.0 }
 0x42a   :  { %697 = vadd.xlane.f32.xlu1 %v696_v21 }
 0x49a   :  { %v947_v22 = vpop.xlane.xlu1 %946 }
 0x49b   :  { %v948_v23 = vsub.f32 %v944_v15, %v947_v22 }
 0x49d   :  { %v949_v24 = vmul.f32 1.442695, %v948_v23 }
 0x49f   :  { %1142 = vpow2.f32 %v949_v24 }
 0x4a9   :  { %v1143_v25 = vpop.eup %1142 }
 0x4aa   :  { %v951_v26 = vsel %vm689_vm5, %v1143_v25, 0.0 }
 0x4ab   :  { %952 = vadd.xlane.f32.xlu1 %v951_v26 }
 0x4b7   :  { %v698_v27 = vpop.xlane.xlu1 %697 }
 0x4b8   :  { %1144 = vrcp.f32 %v698_v27 }
 0x4c2   :  { %v1145_v28 = vpop.eup %1144 }
 0x4c3   :  { %v700_v29 = vmul.f32 %v1145_v28, %v1141_v20 }
 0x4c5   :  { %701 = vst.msk [vmem:[#allocation11] sm:$0x3] %vm689_vm5, %v700_v29 }
 0x4c6   :  { %1269 = shalt.err (!%p1266_p2)
}
 0x4c7   :  { %s1270_s19 = scalar_lea.hbm %s1542_s9, 32 }
 0x4c8   :  { %p1271_p3 = scmp.ne.s32.totalorder %s1542_s9, %s1270_s19  ;;  %p1274_p4 = scmp.lt.u32.totalorder %s1270_s19, %s1542_s9 }
 0x4ca   :  { %p1276_p5 = pnand %p1274_p4, %p1271_p3 }
 0x4cc   :  { %1279 = shalt.err (!%p1276_p5)
}
 0x4cd   :  { %966 = dma.vmem_to_hbm [thread:$0]  %s964_s3, 32, %s1542_s9, [#allocation4]  }
 0x4ce   :  { %s1322_s28 = smov [#allocation12]  }
 0x4cf   :  { %s973_s29 = sshll.u32 %s1322_s28, 4  ;;  %s974_s29 = int_to_ptr.vmem [resolvable:$true] %s973_s29 }
 0x4d0   :  { %s1280_s30 = scalar_lea.vmem %s974_s29, 32  ;;  %p1285_p7 = scmp.lt.s32.totalorder %s974_s29, %s974_s29 }
 0x4d1   :  { %p1281_p6 = scmp.ne.s32.totalorder %s974_s29, %s1280_s30  ;;  %p1286_p8 = scmp.lt.s32.totalorder %s1280_s30, %s1280_s30 }
 0x4d3   :  { %p1287_p9 = por %p1286_p8, %p1285_p7 }
 0x4d5   :  { %p1288_p10 = pnand %p1287_p9, %p1281_p6 }
 0x538   :  { %v953_v30 = vpop.xlane.xlu1 %952 }
 0x539   :  { %1146 = vrcp.f32 %v953_v30 }
 0x543   :  { %v1147_v31 = vpop.eup %1146 }
 0x544   :  { %v955_v32 = vmul.f32 %v1147_v31, %v1143_v25 }
 0x546   :  { %956 = vst.msk [vmem:[#allocation12] sm:$0x3] %vm689_vm5, %v955_v32 }
 0x547   :  { %1291 = shalt.err (!%p1288_p10)
}
 0x548   :  { %s1292_s9 = scalar_lea.hbm %s1543_s10, 32 }
 0x549   :  { %p1293_p11 = scmp.ne.s32.totalorder %s1543_s10, %s1292_s9  ;;  %p1296_p12 = scmp.lt.u32.totalorder %s1292_s9, %s1543_s10 }
 0x54b   :  { %p1298_p13 = pnand %p1296_p12, %p1293_p11 }
 0x54d   :  { %1301 = shalt.err (!%p1298_p13)
}
 0x54e   :  { %976 = dma.vmem_to_hbm [thread:$0]  %s974_s29, 32, %s1543_s10, [#allocation13]  }
 0x54f   :  { %1308 = dma.done.wait [#allocation4], 32  }
 0x550   :  { %1309 = vsyncadd [#allocation4], 4294967264 }
 0x551   :  { %1310 = dma.done.wait [#allocation13], 32  }
 0x552   :  { %1311 = vsyncadd [#allocation13], 4294967264 }
 0x553   :  { %983 = vsyncpa [#allocation3], 1 }
 0x554   :  { %984 = vsyncpa [#allocation6], 1 }
 0x555   :  { %985 = vsyncpa [#allocation9], 1 }
 0x556   :  { %986 = vsyncpa [#allocation4], 1 }
 0x557   :  { %987 = vsyncpa [#allocation13], 1 }

// kernel: tpu_custom_call.1
= control target key start
LH: loop header
LB: loop body
LE: loop exit
PB: predicated region body
PF: predicated region fallthrough
CT: control target
= control target key end

     0   :  { %16 = vsyncpa [#allocation3], 0  ;;  %s1533_s0 = inlined_call_operand.hbm [shape: f32[2,8,32], index: 0, kind: input, shape index: {}]   ;;  %s1534_s1 = inlined_call_operand.hbm [shape: f32[2,8,32], index: 1, kind: input, shape index: {}]   ;;  %s1535_s2 = inlined_call_operand.vmem [shape: f32[2,8], index: 2, kind: input, shape index: {}]   ;;  %s1536_s3 = inlined_call_operand.vmem [shape: f32[2,8], index: 3, kind: input, shape index: {}]   ;;  %s1537_s4 = inlined_call_operand.hbm [shape: f32[32,32], index: 4, kind: input, shape index: {}]   ;;  %s1538_s5 = inlined_call_operand.hbm [shape: f32[32,32], index: 5, kind: input, shape index: {}]   ;;  %s1539_s6 = inlined_call_operand.hbm [shape: f32[32,32], index: 6, kind: input, shape index: {}]   ;;  %s1540_s7 = inlined_call_operand.vmem [shape: f32[1,32], index: 7, kind: input, shape index: {}]   ;;  %s1541_s8 = inlined_call_operand.vmem [shape: f32[1,32], index: 8, kind: input, shape index: {}]   ;;  %s1542_s9 = inlined_call_operand.hbm [shape: f32[2,8], index: 9, kind: output, shape index: {0}]   ;;  %s1543_s10 = inlined_call_operand.hbm [shape: f32[2,8], index: 10, kind: output, shape index: {1}]  }
   0x1   :  { %17 = vsyncpa [#allocation6], 0 }
   0x2   :  { %18 = vsyncpa [#allocation9], 0 }
   0x3   :  { %19 = vsyncpa [#allocation4], 0 }
   0x4   :  { %20 = vsyncpa [#allocation13], 0  ;;  %s1312_s13 = smov [#allocation5]   ;;  %s1313_s15 = smov [#allocation8]  }
   0x5   :  { %s38_s14 = sshll.u32 %s1312_s13, 4  ;;  %s66_s16 = sshll.u32 %s1313_s15, 4  ;;  %s39_s14 = int_to_ptr.vmem [resolvable:$true] %s38_s14  ;;  %s1378_s16 = int_to_ptr.vmem [resolvable:$true] %s66_s16 }
   0x6   :  { %s1148_s19 = scalar_lea.hbm %s1534_s1, 256 }
   0x7   :  { %p1149_p0 = scmp.ne.s32.totalorder %s1534_s1, %s1148_s19  ;;  %p1152_p1 = scmp.lt.u32.totalorder %s1148_s19, %s1534_s1 }
   0x9   :  { %p1154_p2 = pnand %p1152_p1, %p1149_p0 }
   0xb   :  { %1157 = shalt.err (!%p1154_p2)
}
   0xc   :  { %s1158_s24 = scalar_lea.vmem %s39_s14, 256  ;;  %p1163_p4 = scmp.lt.s32.totalorder %s39_s14, %s39_s14 }
   0xd   :  { %p1159_p3 = scmp.ne.s32.totalorder %s39_s14, %s1158_s24  ;;  %p1164_p5 = scmp.lt.s32.totalorder %s1158_s24, %s1158_s24 }
   0xf   :  { %p1165_p6 = por %p1164_p5, %p1163_p4 }
  0x11   :  { %p1166_p7 = pnand %p1165_p6, %p1159_p3 }
  0x13   :  { %1169 = shalt.err (!%p1166_p7)
}
  0x14   :  { %s1314_s25 = smov 128   ;;  %s1315_s26 = smov 8  }
  0x15   :  { %44 = dma.hbm_to_vmem [thread:$0]  %s1534_s1, 256, %s39_s14, [#allocation6], %s1314_s25, %s1314_s25, %s1315_s26  }
  0x16   :  { %s1170_s11 = scalar_lea.hbm %s1538_s5, 512 }
  0x17   :  { %p1171_p8 = scmp.ne.s32.totalorder %s1538_s5, %s1170_s11  ;;  %p1174_p9 = scmp.lt.u32.totalorder %s1170_s11, %s1538_s5 }
  0x19   :  { %p1176_p10 = pnand %p1174_p9, %p1171_p8 }
  0x1b   :  { %1179 = shalt.err (!%p1176_p10)
}
  0x1c   :  { %s1180_s18 = scalar_lea.vmem %s1378_s16, 512  ;;  %p1185_p12 = scmp.lt.s32.totalorder %s1378_s16, %s1378_s16 }
  0x1d   :  { %p1181_p11 = scmp.ne.s32.totalorder %s1378_s16, %s1180_s18  ;;  %p1186_p13 = scmp.lt.s32.totalorder %s1180_s18, %s1180_s18 }
  0x1f   :  { %p1187_p0 = por %p1186_p13, %p1185_p12 }
  0x21   :  { %p1188_p1 = pnand %p1187_p0, %p1181_p11 }
  0x23   :  { %1191 = shalt.err (!%p1188_p1)
}
  0x24   :  { %72 = dma.hbm_to_vmem [thread:$0]  %s1538_s5, 512, %s1378_s16, [#allocation9], %s1314_s25, %s1314_s25, %s1315_s26  }
  0x25   :  { %s1316_s19 = smov [#allocation2]   ;;  %s1317_s21 = smov [#allocation7]  }
  0x26   :  { %s26_s20 = sshll.u32 %s1316_s19, 4  ;;  %s54_s22 = sshll.u32 %s1317_s21, 4  ;;  %s27_s20 = int_to_ptr.vmem [resolvable:$true] %s26_s20  ;;  %s1415_s22 = int_to_ptr.vmem [resolvable:$true] %s54_s22 }
  0x27   :  { %s1192_s27 = scalar_lea.hbm %s1533_s0, 256 }
  0x28   :  { %p1193_p2 = scmp.ne.s32.totalorder %s1533_s0, %s1192_s27  ;;  %p1196_p3 = scmp.lt.u32.totalorder %s1192_s27, %s1533_s0 }
  0x2a   :  { %p1198_p4 = pnand %p1196_p3, %p1193_p2 }
  0x2c   :  { %1201 = shalt.err (!%p1198_p4)
}
  0x2d   :  { %s1202_s5 = scalar_lea.vmem %s27_s20, 256  ;;  %p1207_p6 = scmp.lt.s32.totalorder %s27_s20, %s27_s20 }
  0x2e   :  { %p1203_p5 = scmp.ne.s32.totalorder %s27_s20, %s1202_s5  ;;  %p1208_p7 = scmp.lt.s32.totalorder %s1202_s5, %s1202_s5 }
  0x30   :  { %p1209_p8 = por %p1208_p7, %p1207_p6 }
  0x32   :  { %p1210_p9 = pnand %p1209_p8, %p1203_p5 }
  0x34   :  { %1213 = shalt.err (!%p1210_p9)
}
  0x35   :  { %32 = dma.hbm_to_vmem [thread:$0]  %s1533_s0, 256, %s27_s20, [#allocation3], %s1314_s25, %s1314_s25, %s1315_s26  }
  0x36   :  { %s1214_s17 = scalar_lea.hbm %s1537_s4, 512 }
  0x37   :  { %p1215_p10 = scmp.ne.s32.totalorder %s1537_s4, %s1214_s17  ;;  %p1218_p11 = scmp.lt.u32.totalorder %s1214_s17, %s1537_s4 }
  0x39   :  { %p1220_p12 = pnand %p1218_p11, %p1215_p10 }
  0x3b   :  { %1223 = shalt.err (!%p1220_p12)
}
  0x3c   :  { %s1224_s21 = scalar_lea.vmem %s1415_s22, 512  ;;  %p1229_p0 = scmp.lt.s32.totalorder %s1415_s22, %s1415_s22 }
  0x3d   :  { %p1225_p13 = scmp.ne.s32.totalorder %s1415_s22, %s1224_s21  ;;  %p1230_p1 = scmp.lt.s32.totalorder %s1224_s21, %s1224_s21 }
  0x3f   :  { %p1231_p2 = por %p1230_p1, %p1229_p0 }
  0x41   :  { %p1232_p3 = pnand %p1231_p2, %p1225_p13 }
  0x43   :  { %1235 = shalt.err (!%p1232_p3)
}
  0x44   :  { %60 = dma.hbm_to_vmem [thread:$0]  %s1537_s4, 512, %s1415_s22, [#allocation6], %s1314_s25, %s1314_s25, %s1315_s26  }
  0x45   :  { %s1318_s23 = smov [#allocation10]   ;;  %s1236_s29 = scalar_lea.hbm %s1539_s6, 512 }
  0x46   :  { %s78_s24 = sshll.u32 %s1318_s23, 4  ;;  %p1237_p4 = scmp.ne.s32.totalorder %s1539_s6, %s1236_s29  ;;  %s79_s24 = int_to_ptr.vmem [resolvable:$true] %s78_s24 }
  0x47   :  { %p1240_p5 = scmp.lt.u32.totalorder %s1236_s29, %s1539_s6 }
  0x49   :  { %p1242_p6 = pnand %p1240_p5, %p1237_p4 }
  0x4b   :  { %1245 = shalt.err (!%p1242_p6)
}
  0x4c   :  { %s1246_s12 = scalar_lea.vmem %s79_s24, 512  ;;  %p1251_p8 = scmp.lt.s32.totalorder %s79_s24, %s79_s24 }
  0x4d   :  { %p1247_p7 = scmp.ne.s32.totalorder %s79_s24, %s1246_s12  ;;  %p1252_p9 = scmp.lt.s32.totalorder %s1246_s12, %s1246_s12 }
  0x4f   :  { %p1253_p10 = por %p1252_p9, %p1251_p8 }
  0x51   :  { %p1254_p11 = pnand %p1253_p10, %p1247_p7 }
  0x53   :  { %1257 = shalt.err (!%p1254_p11)
}
  0x54   :  { %84 = dma.hbm_to_vmem [thread:$0]  %s1539_s6, 512, %s79_s24, [#allocation9], %s1314_s25, %s1314_s25, %s1315_s26  }
  0x55   :  { %1302 = dma.done.wait [#allocation3], 256  }
  0x56   :  { %1303 = vsyncadd [#allocation3], 4294967040 }
  0x57   :  { %1304 = dma.done.wait [#allocation6], 768  }
  0x58   :  { %1305 = vsyncadd [#allocation6], 4294966528 }
  0x59   :  { %1306 = dma.done.wait [#allocation9], 1024  }
  0x5a   :  { %1307 = vsyncadd [#allocation9], 4294966272  ;;  %vm112_vm0 = vcmask 261120   ;;  %v108_v0 = vld [vmem:[#allocation7] sm:$0xff]  ;;  %v109_v1 = vld [vmem:[#allocation7 + $0x8] sm:$0xff]  ;;  %v1319_v22 = vmov 0.0   ;;  %v675_v61 = vlaneseq }
  0x5b   :  { %v110_v2 = vld [vmem:[#allocation7 + $0x10] sm:$0xff]  ;;  %v1097_v3 = vpack.c.bf16 %v109_v1, %v108_v0  ;;  %v111_v4 = vld [vmem:[#allocation7 + $0x18] sm:$0xff]  ;;  %v194_v7 = vld [vmem:[#allocation8] sm:$0xff]  ;;  %vm1320_vm1 = vmmov 0   ;;  %vm506_vm2 = vcmask 64512   ;;  %vm685_vm3 = vcmask 1041409  }
  0x5c   :  { %v106_v5 = vld [vmem:[#allocation5] sm:$0xff]  ;;  %v1101_v6 = vpack.c.bf16 %v111_v4, %v110_v2  ;;  %v195_v8 = vld [vmem:[#allocation8 + $0x8] sm:$0xff]  ;;  %v197_v11 = vld [vmem:[#allocation8 + $0x18] sm:$0xff]  ;;  %v676_v62 = vand.u32 127, %v675_v61  ;;  %v678_v63 = vshrl.u32 %v675_v61, 7  ;;  %vm689_vm5 = vcmask 58368  }
  0x5d   :  { %1042 = vmatprep.mubr.msk.f32.mxu0 %vm112_vm0, %v106_v5  ;;  %v196_v9 = vld [vmem:[#allocation8 + $0x10] sm:$0xff]  ;;  %1098 = vmatprep.subr.bf16.mxu0 %v1097_v3  ;;  %v1105_v10 = vpack.c.bf16 %v195_v8, %v194_v7  ;;  %v279_v12 = vld [vmem:[#allocation10] sm:$0xff]  ;;  %v280_v13 = vld [vmem:[#allocation10 + $0x8] sm:$0xff] }
  0x5e   :  { %1100 = vmatpush3.bf16.msra.mxu0 %v1097_v3  ;;  %v1109_v14 = vpack.c.bf16 %v197_v11, %v196_v9  ;;  %v1113_v15 = vpack.c.bf16 %v280_v13, %v279_v12  ;;  %v281_v16 = vld [vmem:[#allocation10 + $0x10] sm:$0xff]  ;;  %v282_v17 = vld [vmem:[#allocation10 + $0x18] sm:$0xff]  ;;  %v104_v20 = vld [vmem:[#allocation2] sm:$0xff]  ;;  %v679_v1 = vsub.s32 %v676_v62, %v678_v63 }
  0x5f   :  { %1102 = vmatprep.subr.bf16.mxu0 %v1101_v6  ;;  %1106 = vmatprep.subr.bf16.mxu1 %v1105_v10  ;;  %v107_v18 = vld [vmem:[#allocation5 + $0x8] sm:$0xff]  ;;  %v1117_v19 = vpack.c.bf16 %v282_v17, %v281_v16  ;;  %v105_v21 = vld [vmem:[#allocation2 + $0x8] sm:$0xff]  ;;  %v1000_v41 = vld [vmem:[%s1540_s7] ss:$0 sm:$0xff] }
  0x60   :  { %1108 = vmatpush3.bf16.msra.mxu1 %v1105_v10  ;;  %1053 = vmatprep.mubr.msk.f32.mxu1 %vm112_vm0, %v104_v20  ;;  %v1003_v54 = vld [vmem:[%s1541_s8] ss:$0 sm:$0xff] }
  0x61   :  { %1110 = vmatprep.subr.bf16.mxu1 %v1109_v14  ;;  %v504_v2 = vld [vmem:[%s1535_s2] sm:$0x3]  ;;  %s1321_s2 = smov [#allocation11]  }
  0x62   :  { %1104 = vmatpush3.bf16.msra.mxu0 %v1101_v6  ;;  %vm672_vm4 = vcmp.eq.f32.partialorder %v504_v2, 0.0  ;;  %v505_v10 = vld [vmem:[%s1536_s3] sm:$0x3]  ;;  %s963_s3 = sshll.u32 %s1321_s2, 4  ;;  %s964_s3 = int_to_ptr.vmem [resolvable:$true] %s963_s3 }
  0x63   :  { %1114 = vmatprep.subr.bf16.mxu0 %v1113_v15  ;;  %vm931_vm6 = vcmp.eq.f32.partialorder %v505_v10, 0.0  ;;  %s1258_s18 = scalar_lea.vmem %s964_s3, 32  ;;  %p1263_p13 = scmp.lt.s32.totalorder %s964_s3, %s964_s3 }
  0x64   :  { %1112 = vmatpush3.bf16.msra.mxu1 %v1109_v14  ;;  %p1259_p12 = scmp.ne.s32.totalorder %s964_s3, %s1258_s18  ;;  %p1264_p0 = scmp.lt.s32.totalorder %s1258_s18, %s1258_s18 }
  0x65   :  { %1043 = vmatmul.mubr.msk.f32.vlgmr.msra.gmra.mrb[0].mxu0 %vm112_vm0, %v107_v18  ;;  %1067 = vmatprep.subr.mxu1 %v1319_v22 }
  0x66   :  { %1116 = vmatpush3.bf16.msra.mxu0 %v1113_v15  ;;  %1064 = vmatprep.mubr.msk.f32.mxu0 %vm112_vm0, %v106_v5  ;;  %p1265_p1 = por %p1264_p0, %p1263_p13 }
  0x67   :  { %1118 = vmatprep.subr.bf16.mxu0 %v1117_v19  ;;  %1054 = vmatmul.mubr.msk.f32.vlgmr.msra.gmra.mrb[0].mxu1 %vm112_vm0, %v105_v21 }
  0x68   :  { %1069 = vmatprep.mubr.msk.f32.mxu1 %vm1320_vm1, %v1319_v22  ;;  %p1266_p2 = pnand %p1265_p1, %p1259_p12 }
  0x6a   :  { %1120 = vmatpush3.bf16.msra.mxu0 %v1117_v19 }
  0x6b   :  { %1077 = vmatprep.subr.mxu0 %v1319_v22 }
  0x6d   :  { %1065 = vmatmul.mubr.msk.f32.vlgmr.msra.gmra.mrb[2].mxu0 %vm112_vm0, %v107_v18 }
  0x6e   :  { %1079 = vmatprep.mubr.msk.f32.mxu0 %vm1320_vm1, %v1319_v22 }
 0x138   :  { %v1044_v23 = vpop.f32.mrb[0].mxu0 }
 0x139   :  { %v185_v24 = vpop.f32.mrb[1].mxu0 }
 0x13a   :  { %1068 = vmatpush3.xpose.msk.msra.mxu1 %vm112_vm0, %v185_v24  ;;  %v1055_v27 = vpop.f32.mrb[0].mxu1 }
 0x13b   :  { %1072 = vmatprep.subr.mxu1 %v1319_v22  ;;  %v270_v28 = vpop.f32.mrb[1].mxu1 }
 0x13d   :  { %1070 = vmatmul.mubr.msk.f32.vlgmr.msra.gmra.mrb[2].mxu1 %vm112_vm0, %v104_v20 }
 0x13e   :  { %1073 = vmatpush3.xpose.msk.msra.mxu1 %vm112_vm0, %v1044_v23  ;;  %1074 = vmatprep.mubr.msk.f32.mxu1 %vm1320_vm1, %v1319_v22 }
 0x13f   :  { %1082 = vmatprep.subr.mxu1 %v1319_v22 }
 0x140   :  { %v1066_v25 = vpop.f32.mrb[2].mxu0 }
 0x141   :  { %1075 = vmatmul.mubr.msk.f32.vlgmr.msra.gmra.mrb[4].mxu1 %vm112_vm0, %v105_v21  ;;  %v349_v26 = vpop.f32.mrb[3].mxu0 }
 0x142   :  { %1078 = vmatpush3.msra.mxu0 %v349_v26  ;;  %1083 = vmatpush3.msra.mxu1 %v1066_v25 }
 0x143   :  { %1087 = vmatprep.subr.mxu0 %v1319_v22  ;;  %1084 = vmatprep.mubr.msk.f32.mxu1 %vm1320_vm1, %v1319_v22 }
 0x144   :  { %1092 = vmatprep.subr.mxu1 %v1319_v22 }
 0x210   :  { %v427_v29 = vpop.f32.mrb[2].mxu1 }
 0x211   :  { %702 = vxpose.xlu0.b32.start.end [1/1] (short) (narrow) %v427_v29, 8  ;;  %v1071_v30 = vpop.f32.mrb[3].mxu1  ;;  %1080 = vmatmul.mubr.msk.f32.vlgmr.msra.gmra.mrb[4].mxu0 %vm506_vm2, %v427_v29 }
 0x212   :  { %1088 = vmatpush3.msra.mxu0 %v270_v28  ;;  %1089 = vmatprep.mubr.msk.f32.mxu0 %vm1320_vm1, %v1319_v22 }
 0x214   :  { %v500_v31 = vpop.f32.mrb[4].mxu1 }
 0x215   :  { %807 = vxpose.xlu0.b32.start.end [1/1] (short) (narrow) %v500_v31, 8  ;;  %v1076_v32 = vpop.f32.mrb[5].mxu1  ;;  %1085 = vmatmul.mubr.msk.f32.vlgmr.msra.gmra.mrb[6].mxu1 %vm506_vm2, %v500_v31 }
 0x216   :  { %1093 = vmatpush3.msra.mxu1 %v1055_v27  ;;  %1094 = vmatprep.mubr.msk.f32.mxu1 %vm1320_vm1, %v1319_v22 }
 0x291   :  { %v718_v33 = vpop.trf.xlu0 }
 0x292   :  { %1090 = vmatmul.mubr.msk.f32.vlgmr.msra.gmra.mrb[6].mxu0 %vm506_vm2, %v718_v33 }
 0x295   :  { %v823_v34 = vpop.trf.xlu0 }
 0x296   :  { %1095 = vmatmul.mubr.msk.f32.vlgmr.msra.gmra.mrb[8].mxu1 %vm506_vm2, %v823_v34 }
 0x2e4   :  { %v576_v35 = vpop.f32.mrb[4].mxu0 }
 0x2e5   :  { %v653_v36 = vadd.f32 %v576_v35, %v270_v28  ;;  %v1081_v37 = vpop.f32.mrb[5].mxu0 }
 0x2e7   :  { %1132 = vtanh.f32 %v653_v36 }
 0x2e8   :  { %v649_v38 = vpop.f32.mrb[6].mxu1 }
 0x2e9   :  { %v654_v39 = vadd.f32 %v1055_v27, %v649_v38  ;;  %v1086_v40 = vpop.f32.mrb[7].mxu1 }
 0x2eb   :  { %1134 = vtanh.f32 %v654_v39 }
 0x2f1   :  { %v1133_v42 = vpop.eup %1132 }
 0x2f2   :  { %v664_v43 = vmul.f32 %v1133_v42, %v1000_v41 }
 0x2f4   :  { %v666_v44 = vsel %vm112_vm0, %v664_v43, 0.0 }
 0x2f5   :  { %v1135_v45 = vpop.eup %1134  ;;  %667 = vadd.xlane.f32.xlu1 %v666_v44 }
 0x2f6   :  { %v665_v46 = vmul.f32 %v1135_v45, %v1000_v41 }
 0x2f8   :  { %v669_v47 = vsel %vm112_vm0, %v665_v46, 0.0 }
 0x2f9   :  { %670 = vadd.xlane.f32.xlu1 %v669_v47 }
 0x365   :  { %v803_v48 = vpop.f32.mrb[6].mxu0 }
 0x366   :  { %v912_v49 = vadd.f32 %v803_v48, %v349_v26  ;;  %v1091_v50 = vpop.f32.mrb[7].mxu0 }
 0x368   :  { %1136 = vtanh.f32 %v912_v49 }
 0x369   :  { %v908_v51 = vpop.f32.mrb[8].mxu1 }
 0x36a   :  { %v913_v52 = vadd.f32 %v1066_v25, %v908_v51  ;;  %v1096_v53 = vpop.f32.mrb[9].mxu1 }
 0x36c   :  { %1138 = vtanh.f32 %v913_v52 }
 0x372   :  { %v1137_v55 = vpop.eup %1136 }
 0x373   :  { %v923_v56 = vmul.f32 %v1137_v55, %v1003_v54 }
 0x375   :  { %v925_v57 = vsel %vm112_vm0, %v923_v56, 0.0 }
 0x376   :  { %v1139_v58 = vpop.eup %1138  ;;  %926 = vadd.xlane.f32.xlu0 %v925_v57 }
 0x377   :  { %v924_v59 = vmul.f32 %v1139_v58, %v1003_v54 }
 0x379   :  { %v928_v60 = vsel %vm112_vm0, %v924_v59, 0.0 }
 0x37a   :  { %929 = vadd.xlane.f32.xlu1 %v928_v60 }
 0x382   :  { %v668_v0 = vpop.xlane.xlu1 %667 }
 0x383   :  { %v680_v4 = vrot.slane %v668_v0, %v679_v1 }
 0x386   :  { %v671_v3 = vpop.xlane.xlu1 %670 }
 0x387   :  { %v684_v5 = vrot.slane %v671_v3, %v679_v1 }
 0x389   :  { %v686_v6 = vsel %vm685_vm3, %v684_v5, %v680_v4 }
 0x38a   :  { %v688_v7 = vsel %vm672_vm4, -inf, %v686_v6 }
 0x38b   :  { %v690_v8 = vsel %vm689_vm5, %v688_v7, -inf }
 0x38c   :  { %691 = vmax.xlane.f32.xlu1 %v690_v8 }
 0x403   :  { %v927_v9 = vpop.xlane.xlu0 %926 }
 0x404   :  { %v937_v12 = vrot.slane %v927_v9, %v679_v1 }
 0x407   :  { %v930_v11 = vpop.xlane.xlu1 %929 }
 0x408   :  { %v941_v13 = vrot.slane %v930_v11, %v679_v1 }
 0x40a   :  { %v942_v14 = vsel %vm685_vm3, %v941_v13, %v937_v12 }
 0x40b   :  { %v944_v15 = vsel %vm931_vm6, -inf, %v942_v14 }
 0x40c   :  { %v945_v16 = vsel %vm689_vm5, %v944_v15, -inf }
 0x40d   :  { %946 = vmax.xlane.f32.xlu1 %v945_v16 }
 0x419   :  { %v692_v17 = vpop.xlane.xlu1 %691 }
 0x41a   :  { %v693_v18 = vsub.f32 %v688_v7, %v692_v17 }
 0x41c   :  { %v694_v19 = vmul.f32 1.442695, %v693_v18 }
 0x41e   :  { %1140 = vpow2.f32 %v694_v19 }
 0x428   :  { %v1141_v20 = vpop.eup %1140 }
 0x429   :  { %v696_v21 = vsel %vm689_vm5, %v1141_v20, 0.0 }
 0x42a   :  { %697 = vadd.xlane.f32.xlu1 %v696_v21 }
 0x49a   :  { %v947_v22 = vpop.xlane.xlu1 %946 }
 0x49b   :  { %v948_v23 = vsub.f32 %v944_v15, %v947_v22 }
 0x49d   :  { %v949_v24 = vmul.f32 1.442695, %v948_v23 }
 0x49f   :  { %1142 = vpow2.f32 %v949_v24 }
 0x4a9   :  { %v1143_v25 = vpop.eup %1142 }
 0x4aa   :  { %v951_v26 = vsel %vm689_vm5, %v1143_v25, 0.0 }
 0x4ab   :  { %952 = vadd.xlane.f32.xlu1 %v951_v26 }
 0x4b7   :  { %v698_v27 = vpop.xlane.xlu1 %697 }
 0x4b8   :  { %1144 = vrcp.f32 %v698_v27 }
 0x4c2   :  { %v1145_v28 = vpop.eup %1144 }
 0x4c3   :  { %v700_v29 = vmul.f32 %v1145_v28, %v1141_v20 }
 0x4c5   :  { %701 = vst.msk [vmem:[#allocation11] sm:$0x3] %vm689_vm5, %v700_v29 }
 0x4c6   :  { %1269 = shalt.err (!%p1266_p2)
}
 0x4c7   :  { %s1270_s19 = scalar_lea.hbm %s1542_s9, 32 }
 0x4c8   :  { %p1271_p3 = scmp.ne.s32.totalorder %s1542_s9, %s1270_s19  ;;  %p1274_p4 = scmp.lt.u32.totalorder %s1270_s19, %s1542_s9 }
 0x4ca   :  { %p1276_p5 = pnand %p1274_p4, %p1271_p3 }
 0x4cc   :  { %1279 = shalt.err (!%p1276_p5)
}
 0x4cd   :  { %966 = dma.vmem_to_hbm [thread:$0]  %s964_s3, 32, %s1542_s9, [#allocation4]  }
 0x4ce   :  { %s1322_s28 = smov [#allocation12]  }
 0x4cf   :  { %s973_s29 = sshll.u32 %s1322_s28, 4  ;;  %s974_s29 = int_to_ptr.vmem [resolvable:$true] %s973_s29 }
 0x4d0   :  { %s1280_s30 = scalar_lea.vmem %s974_s29, 32  ;;  %p1285_p7 = scmp.lt.s32.totalorder %s974_s29, %s974_s29 }
 0x4d1   :  { %p1281_p6 = scmp.ne.s32.totalorder %s974_s29, %s1280_s30  ;;  %p1286_p8 = scmp.lt.s32.totalorder %s1280_s30, %s1280_s30 }
 0x4d3   :  { %p1287_p9 = por %p1286_p8, %p1285_p7 }
 0x4d5   :  { %p1288_p10 = pnand %p1287_p9, %p1281_p6 }
 0x538   :  { %v953_v30 = vpop.xlane.xlu1 %952 }
 0x539   :  { %1146 = vrcp.f32 %v953_v30 }
 0x543   :  { %v1147_v31 = vpop.eup %1146 }
 0x544   :  { %v955_v32 = vmul.f32 %v1147_v31, %v1143_v25 }
 0x546   :  { %956 = vst.msk [vmem:[#allocation12] sm:$0x3] %vm689_vm5, %v955_v32 }
 0x547   :  { %1291 = shalt.err (!%p1288_p10)
}
 0x548   :  { %s1292_s9 = scalar_lea.hbm %s1543_s10, 32 }
 0x549   :  { %p1293_p11 = scmp.ne.s32.totalorder %s1543_s10, %s1292_s9  ;;  %p1296_p12 = scmp.lt.u32.totalorder %s1292_s9, %s1543_s10 }
 0x54b   :  { %p1298_p13 = pnand %p1296_p12, %p1293_p11 }
 0x54d   :  { %1301 = shalt.err (!%p1298_p13)
}
 0x54e   :  { %976 = dma.vmem_to_hbm [thread:$0]  %s974_s29, 32, %s1543_s10, [#allocation13]  }
 0x54f   :  { %1308 = dma.done.wait [#allocation4], 32  }
 0x550   :  { %1309 = vsyncadd [#allocation4], 4294967264 }
 0x551   :  { %1310 = dma.done.wait [#allocation13], 32  }
 0x552   :  { %1311 = vsyncadd [#allocation13], 4294967264 }
 0x553   :  { %983 = vsyncpa [#allocation3], 1 }
 0x554   :  { %984 = vsyncpa [#allocation6], 1 }
 0x555   :  { %985 = vsyncpa [#allocation9], 1 }
 0x556   :  { %986 = vsyncpa [#allocation4], 1 }
 0x557   :  { %987 = vsyncpa [#allocation13], 1 }

</bundles_post_ra>
